<compile_context>
chip_gen: v7x
topology: tpu7x:2x2x1
jax: 0.10.0
libtpu: 0.0.40
codegen_flags: <defaults>
</compile_context>

<pallas_src>
import functools

import jax
import jax.numpy as jnp
from jax import lax
from jax.experimental import pallas as pl
from jax.experimental.pallas import tpu as pltpu


def _pointcn_kernel(x_ref, w_in_ref, w_hid_ref, scale_ref, shift_ref, o_ref, *,
                    num_layers, num_points, block_b):
    """One grid step: `block_b` batch elements through the whole encoder."""
    C = w_in_ref.shape[0]
    n_pad = x_ref.shape[-1]
    inv_n = 1.0 / num_points
    inv_nm1 = 1.0 / (num_points - 1) if num_points > 1 else 1.0
    padded = num_points < n_pad
    if padded:
        # Lane-validity mask, hoisted: built once, reused every layer / batch.
        valid = lax.broadcasted_iota(jnp.int32, (C, n_pad), 1) < num_points

    def cn_bn_relu(h, l):
        # ContextNorm (over points) + eval-mode BatchNorm + ReLU, fused.
        # One XLU reduction pass yields both moments.
        sums = jnp.sum(jnp.concatenate([h, h * h], axis=0),
                       axis=-1, keepdims=True)                      # (2C, 1)
        mean = sums[:C] * inv_n
        var = (sums[C:] - mean * mean * num_points) * inv_nm1       # unbiased
        s = lax.rsqrt(var + 1e-3) * scale_ref[l]                    # CN*BN scale
        out = jnp.maximum((h - mean) * s + shift_ref[l], 0.0)
        if padded:
            out = jnp.where(valid, out, 0.0)   # keep padded lanes exactly zero
        return out

    for b in range(block_b):
        # Layer 0: input Conv1d folded into the first per-layer Conv1d
        # (exact: no nonlinearity between them; biases cancel under CN).
        h = jnp.dot(w_in_ref[...], x_ref[b],
                    preferred_element_type=jnp.float32)             # (C, n_pad)
        h = cn_bn_relu(h, 0)
        for l in range(num_layers - 1):
            h = jnp.dot(w_hid_ref[l], h.astype(jnp.bfloat16),
                        preferred_element_type=jnp.float32)
            h = cn_bn_relu(h, l + 1)
        o_ref[b] = h


def _pick_block_b(batch, in_dim, num_channels, n_pad,
                  vmem_budget_bytes=8 * 1024 * 1024):
    """Largest batch block that keeps >=2 grid steps (both v7x TCs busy) and a
    conservative VMEM footprint (v7x: 64 MiB physical, 32 MiB default scoped)."""
    def est_bytes(d):
        x_blk = d * in_dim * n_pad * 2            # bf16 input block
        o_blk = d * num_channels * n_pad * 4      # f32 output block
        live = 6 * num_channels * n_pad * 4       # h / h*h / concat temporaries
        return 2 * (x_blk + o_blk) + live         # in/out double-buffered
    best = 1
    for d in range(1, batch + 1):
        if batch % d:
            continue
        if batch > 1 and batch // d < 2:
            continue
        if est_bytes(d) <= vmem_budget_bytes:
            best = d
    return best


def pointcn_forward(x, w0, wl, bn_scale, bn_shift, *, block_b=None):
    """PointCN forward (act_pos='post').

    x:        (B, in_dim, N) float32   NCW layout, as for torch Conv1d
    w0:       (C, in_dim)              input Conv1d weight (kernel_size=1)
    wl:       (L, C, C)                per-layer Conv1d weights
    bn_scale: (L, C, 1)                eval BatchNorm1d folded scale
    bn_shift: (L, C, 1)                eval BatchNorm1d folded shift

    Conv1d biases are omitted on purpose: any per-channel constant added
    before ContextNormalization is removed exactly by its mean subtraction.
    """
    B, in_dim, n_true = x.shape
    L, C, _ = wl.shape

    # Fold the input conv into layer 0's conv and present bf16 matmul operands
    # (single-pass MXU, f32 accumulation inside the kernel).
    w_in = jnp.dot(wl[0], w0).astype(jnp.bfloat16)                  # (C, in_dim)
    w_hid = (wl[1:] if L > 1 else jnp.zeros((1, C, C), wl.dtype)
             ).astype(jnp.bfloat16)
    Lh = w_hid.shape[0]

    # Lane-dense points axis: pad N to a multiple of 128; statistics use the
    # true N and padded lanes are masked to zero inside the kernel.
    n_pad = ((n_true + 127) // 128) * 128
    if n_pad != n_true:
        x = jnp.pad(x, ((0, 0), (0, 0), (0, n_pad - n_true)))
    x = x.astype(jnp.bfloat16)

    if block_b is None:
        block_b = _pick_block_b(B, in_dim, C, n_pad)
    assert B % block_b == 0, (B, block_b)
    grid = (B // block_b,)

    kernel = functools.partial(_pointcn_kernel, num_layers=L,
                               num_points=n_true, block_b=block_b)
    out = pl.pallas_call(
        kernel,
        out_shape=jax.ShapeDtypeStruct((B, C, n_pad), jnp.float32),
        grid_spec=pltpu.PrefetchScalarGridSpec(
            num_scalar_prefetch=0,
            grid=grid,
            in_specs=[
                pl.BlockSpec((block_b, in_dim, n_pad), lambda b: (b, 0, 0)),  # x
                pl.BlockSpec((C, in_dim), lambda b: (0, 0)),        # folded conv0
                pl.BlockSpec((Lh, C, C), lambda b: (0, 0, 0)),      # hidden convs
                pl.BlockSpec((L, C, 1), lambda b: (0, 0, 0)),       # BN scale
                pl.BlockSpec((L, C, 1), lambda b: (0, 0, 0)),       # BN shift
            ],
            out_specs=pl.BlockSpec((block_b, C, n_pad), lambda b: (b, 0, 0)),
        ),
        compiler_params=pltpu.CompilerParams(
            dimension_semantics=("parallel",)),
    )(x, w_in, w_hid, bn_scale, bn_shift)
    if n_pad != n_true:
        out = out[..., :n_true]
    return out


def pointcn_reference(x, w0, wl, bn_scale, bn_shift):
    """Pure-JAX reference with the same numerics as the kernel (bf16 matmul
    operands, f32 accumulation, folded first conv, biases cancelled by CN);
    the CN variance uses the torch-style two-pass unbiased formula."""
    L = wl.shape[0]
    N = x.shape[-1]
    w_in = jnp.dot(wl[0], w0).astype(jnp.bfloat16)

    def cn_bn_relu(h, l):
        mean = jnp.mean(h, axis=-1, keepdims=True)
        var = jnp.sum((h - mean) ** 2, axis=-1, keepdims=True) / (N - 1)
        h = (h - mean) / jnp.sqrt(var + 1e-3)
        return jnp.maximum(h * bn_scale[l][None] + bn_shift[l][None], 0.0)

    h = jnp.einsum('oc,bcn->bon', w_in, x.astype(jnp.bfloat16),
                   preferred_element_type=jnp.float32)
    h = cn_bn_relu(h, 0)
    for l in range(1, L):
        h = jnp.einsum('oc,bcn->bon', wl[l].astype(jnp.bfloat16),
                       h.astype(jnp.bfloat16),
                       preferred_element_type=jnp.float32)
        h = cn_bn_relu(h, l)
    return h


if __name__ == "__main__":
    def make_params(key, in_dim, num_layers, num_channels):
        k0, k1, k2, k3, k4, k5 = jax.random.split(key, 6)
        w0 = jax.random.normal(k0, (num_channels, in_dim),
                               jnp.float32) / jnp.sqrt(in_dim)
        wl = jax.random.normal(k1, (num_layers, num_channels, num_channels),
                               jnp.float32) / jnp.sqrt(num_channels)
        # Eval-mode BatchNorm1d folded into per-channel scale/shift (non-trivial
        # values to actually exercise the affine path).
        gamma = 1.0 + 0.1 * jax.random.normal(
            k2, (num_layers, num_channels, 1), jnp.float32)
        beta = 0.1 * jax.random.normal(
            k3, (num_layers, num_channels, 1), jnp.float32)
        running_mean = 0.1 * jax.random.normal(
            k4, (num_layers, num_channels, 1), jnp.float32)
        running_var = jax.random.uniform(
            k5, (num_layers, num_channels, 1), jnp.float32,
            minval=0.5, maxval=1.5)
        bn_scale = gamma / jnp.sqrt(running_var + 1e-5)
        bn_shift = beta - running_mean * bn_scale
        # NOTE: Conv1d biases are not generated: a per-channel constant added
        # before ContextNormalization cancels exactly under its mean
        # subtraction, so they never affect the forward output.
        return w0, wl, bn_scale, bn_shift

    key = jax.random.PRNGKey(0)
    # Small shapes consistent with PointCN(in_dim=6, num_layers=6, ...).
    # Second case exercises lane padding (N=200 -> 256) and batch blocking
    # (block_b=2, grid=(2,)).
    for (B, in_dim, N, L, C) in [(2, 6, 256, 6, 32), (4, 6, 200, 6, 32)]:
        key, kx, kp = jax.random.split(key, 3)
        x = jax.random.normal(kx, (B, in_dim, N), jnp.float32)
        w0, wl, bn_scale, bn_shift = make_params(kp, in_dim, L, C)

        out = pointcn_forward(x, w0, wl, bn_scale, bn_shift)
        out = jax.block_until_ready(out)

        ref = pointcn_reference(x, w0, wl, bn_scale, bn_shift)
        assert out.shape == (B, C, N), out.shape
        max_err = float(jnp.max(jnp.abs(out - ref)))
        assert jnp.allclose(out, ref, atol=1e-2, rtol=1e-2), (B, N, max_err)

    print("KERNEL_OK")
</pallas_src>

<mosaic_0001>
module attributes {stable_mosaic.version = 11 : i64} {
  func.func @_pointcn_kernel(%arg0: i32, %arg1: memref<1x6x256xbf16, #tpu.memory_space<vmem>>, %arg2: memref<32x6xbf16, #tpu.memory_space<vmem>>, %arg3: memref<5x32x32xbf16, #tpu.memory_space<vmem>>, %arg4: memref<6x32x1xf32, #tpu.memory_space<vmem>>, %arg5: memref<6x32x1xf32, #tpu.memory_space<vmem>>, %arg6: memref<1x32x256xf32, #tpu.memory_space<vmem>>) attributes {dimension_semantics = [#tpu.dimension_semantics<parallel>], iteration_bounds = array<i64: 2>, scalar_prefetch = 0 : i64, scratch_operands = 0 : i64, tpu.core_type = #tpu.core_type<tc>, window_params = [{transform_indices = @transform_0, window_bounds = array<i64: 1, 6, 256>}, {pipeline_mode = #tpu.pipeline_mode<synchronous>, transform_indices = @transform_1, window_bounds = array<i64: 32, 6>}, {pipeline_mode = #tpu.pipeline_mode<synchronous>, transform_indices = @transform_2, window_bounds = array<i64: 5, 32, 32>}, {pipeline_mode = #tpu.pipeline_mode<synchronous>, transform_indices = @transform_3, window_bounds = array<i64: 6, 32, 1>}, {pipeline_mode = #tpu.pipeline_mode<synchronous>, transform_indices = @transform_4, window_bounds = array<i64: 6, 32, 1>}, {transform_indices = @transform_5, window_bounds = array<i64: 1, 32, 256>}]} {
    %c0 = arith.constant 0 : index
    %c0_0 = arith.constant 0 : index
    %0 = vector.load %arg2[%c0, %c0_0] : memref<32x6xbf16, #tpu.memory_space<vmem>>, vector<32x6xbf16>
    %c0_1 = arith.constant 0 : index
    %c0_2 = arith.constant 0 : index
    %c0_3 = arith.constant 0 : index
    %1 = vector.load %arg1[%c0_1, %c0_2, %c0_3] : memref<1x6x256xbf16, #tpu.memory_space<vmem>>, vector<1x6x256xbf16>
    %2 = vector.shape_cast %1 : vector<1x6x256xbf16> to vector<6x256xbf16>
    %cst = arith.constant dense<0.000000e+00> : vector<32x256xf32>
    %3 = tpu.matmul %0, %2, %cst {dimension_numbers = #tpu.dot_dimension_numbers<[1], [0], [0], [1], [0, 0, 1, 1], [], []>} : vector<32x6xbf16>, vector<6x256xbf16>, vector<32x256xf32> -> vector<32x256xf32>
    %4 = arith.mulf %3, %3 : vector<32x256xf32>
    %5 = tpu.concatenate %3, %4 in 0 : vector<32x256xf32>, vector<32x256xf32> -> vector<64x256xf32>
    %cst_4 = arith.constant dense<0.000000e+00> : vector<64xf32>
    %6 = vector.multi_reduction <add>, %5, %cst_4 [1] : vector<64x256xf32> to vector<64xf32>
    %7 = vector.shape_cast %6 : vector<64xf32> to vector<64x1xf32>
    %8 = vector.extract_strided_slice %7 {offsets = [0, 0], sizes = [32, 1], strides = [1, 1]} : vector<64x1xf32> to vector<32x1xf32>
    %cst_5 = arith.constant 3.906250e-03 : f32
    %9 = vector.broadcast %cst_5 : f32 to vector<32x1xf32>
    %10 = arith.mulf %8, %9 : vector<32x1xf32>
    %11 = vector.extract_strided_slice %7 {offsets = [32, 0], sizes = [32, 1], strides = [1, 1]} : vector<64x1xf32> to vector<32x1xf32>
    %12 = arith.mulf %10, %10 : vector<32x1xf32>
    %cst_6 = arith.constant 2.560000e+02 : f32
    %13 = vector.broadcast %cst_6 : f32 to vector<32x1xf32>
    %14 = arith.mulf %12, %13 : vector<32x1xf32>
    %15 = arith.subf %11, %14 : vector<32x1xf32>
    %cst_7 = arith.constant 0.00392156886 : f32
    %16 = vector.broadcast %cst_7 : f32 to vector<32x1xf32>
    %17 = arith.mulf %15, %16 : vector<32x1xf32>
    %cst_8 = arith.constant 1.000000e-03 : f32
    %18 = vector.broadcast %cst_8 : f32 to vector<32x1xf32>
    %19 = arith.addf %17, %18 : vector<32x1xf32>
    %20 = math.rsqrt %19 : vector<32x1xf32>
    %c0_9 = arith.constant 0 : index
    %c0_10 = arith.constant 0 : index
    %c0_11 = arith.constant 0 : index
    %21 = vector.load %arg4[%c0_9, %c0_10, %c0_11] : memref<6x32x1xf32, #tpu.memory_space<vmem>>, vector<1x32x1xf32>
    %22 = vector.shape_cast %21 : vector<1x32x1xf32> to vector<32x1xf32>
    %23 = arith.mulf %20, %22 : vector<32x1xf32>
    %24 = vector.broadcast %10 : vector<32x1xf32> to vector<32x256xf32>
    %25 = arith.subf %3, %24 : vector<32x256xf32>
    %26 = vector.broadcast %23 : vector<32x1xf32> to vector<32x256xf32>
    %27 = arith.mulf %25, %26 : vector<32x256xf32>
    %c0_12 = arith.constant 0 : index
    %c0_13 = arith.constant 0 : index
    %c0_14 = arith.constant 0 : index
    %28 = vector.load %arg5[%c0_12, %c0_13, %c0_14] : memref<6x32x1xf32, #tpu.memory_space<vmem>>, vector<1x32x1xf32>
    %29 = vector.shape_cast %28 : vector<1x32x1xf32> to vector<32x1xf32>
    %30 = vector.broadcast %29 : vector<32x1xf32> to vector<32x256xf32>
    %31 = arith.addf %27, %30 : vector<32x256xf32>
    %cst_15 = arith.constant 0.000000e+00 : f32
    %32 = vector.broadcast %cst_15 : f32 to vector<32x256xf32>
    %33 = arith.maximumf %31, %32 : vector<32x256xf32>
    %c0_16 = arith.constant 0 : index
    %c0_17 = arith.constant 0 : index
    %c0_18 = arith.constant 0 : index
    %34 = vector.load %arg3[%c0_16, %c0_17, %c0_18] : memref<5x32x32xbf16, #tpu.memory_space<vmem>>, vector<1x32x32xbf16>
    %35 = vector.shape_cast %34 : vector<1x32x32xbf16> to vector<32x32xbf16>
    %36 = arith.truncf %33 : vector<32x256xf32> to vector<32x256xbf16>
    %cst_19 = arith.constant dense<0.000000e+00> : vector<32x256xf32>
    %37 = tpu.matmul %35, %36, %cst_19 {dimension_numbers = #tpu.dot_dimension_numbers<[1], [0], [0], [1], [0, 0, 1, 1], [], []>} : vector<32x32xbf16>, vector<32x256xbf16>, vector<32x256xf32> -> vector<32x256xf32>
    %38 = arith.mulf %37, %37 : vector<32x256xf32>
    %39 = tpu.concatenate %37, %38 in 0 : vector<32x256xf32>, vector<32x256xf32> -> vector<64x256xf32>
    %cst_20 = arith.constant dense<0.000000e+00> : vector<64xf32>
    %40 = vector.multi_reduction <add>, %39, %cst_20 [1] : vector<64x256xf32> to vector<64xf32>
    %41 = vector.shape_cast %40 : vector<64xf32> to vector<64x1xf32>
    %42 = vector.extract_strided_slice %41 {offsets = [0, 0], sizes = [32, 1], strides = [1, 1]} : vector<64x1xf32> to vector<32x1xf32>
    %cst_21 = arith.constant 3.906250e-03 : f32
    %43 = vector.broadcast %cst_21 : f32 to vector<32x1xf32>
    %44 = arith.mulf %42, %43 : vector<32x1xf32>
    %45 = vector.extract_strided_slice %41 {offsets = [32, 0], sizes = [32, 1], strides = [1, 1]} : vector<64x1xf32> to vector<32x1xf32>
    %46 = arith.mulf %44, %44 : vector<32x1xf32>
    %cst_22 = arith.constant 2.560000e+02 : f32
    %47 = vector.broadcast %cst_22 : f32 to vector<32x1xf32>
    %48 = arith.mulf %46, %47 : vector<32x1xf32>
    %49 = arith.subf %45, %48 : vector<32x1xf32>
    %cst_23 = arith.constant 0.00392156886 : f32
    %50 = vector.broadcast %cst_23 : f32 to vector<32x1xf32>
    %51 = arith.mulf %49, %50 : vector<32x1xf32>
    %cst_24 = arith.constant 1.000000e-03 : f32
    %52 = vector.broadcast %cst_24 : f32 to vector<32x1xf32>
    %53 = arith.addf %51, %52 : vector<32x1xf32>
    %54 = math.rsqrt %53 : vector<32x1xf32>
    %c1 = arith.constant 1 : index
    %c0_25 = arith.constant 0 : index
    %c0_26 = arith.constant 0 : index
    %55 = vector.load %arg4[%c1, %c0_25, %c0_26] : memref<6x32x1xf32, #tpu.memory_space<vmem>>, vector<1x32x1xf32>
    %56 = vector.shape_cast %55 : vector<1x32x1xf32> to vector<32x1xf32>
    %57 = arith.mulf %54, %56 : vector<32x1xf32>
    %58 = vector.broadcast %44 : vector<32x1xf32> to vector<32x256xf32>
    %59 = arith.subf %37, %58 : vector<32x256xf32>
    %60 = vector.broadcast %57 : vector<32x1xf32> to vector<32x256xf32>
    %61 = arith.mulf %59, %60 : vector<32x256xf32>
    %c1_27 = arith.constant 1 : index
    %c0_28 = arith.constant 0 : index
    %c0_29 = arith.constant 0 : index
    %62 = vector.load %arg5[%c1_27, %c0_28, %c0_29] : memref<6x32x1xf32, #tpu.memory_space<vmem>>, vector<1x32x1xf32>
    %63 = vector.shape_cast %62 : vector<1x32x1xf32> to vector<32x1xf32>
    %64 = vector.broadcast %63 : vector<32x1xf32> to vector<32x256xf32>
    %65 = arith.addf %61, %64 : vector<32x256xf32>
    %cst_30 = arith.constant 0.000000e+00 : f32
    %66 = vector.broadcast %cst_30 : f32 to vector<32x256xf32>
    %67 = arith.maximumf %65, %66 : vector<32x256xf32>
    %c1_31 = arith.constant 1 : index
    %c0_32 = arith.constant 0 : index
    %c0_33 = arith.constant 0 : index
    %68 = vector.load %arg3[%c1_31, %c0_32, %c0_33] : memref<5x32x32xbf16, #tpu.memory_space<vmem>>, vector<1x32x32xbf16>
    %69 = vector.shape_cast %68 : vector<1x32x32xbf16> to vector<32x32xbf16>
    %70 = arith.truncf %67 : vector<32x256xf32> to vector<32x256xbf16>
    %cst_34 = arith.constant dense<0.000000e+00> : vector<32x256xf32>
    %71 = tpu.matmul %69, %70, %cst_34 {dimension_numbers = #tpu.dot_dimension_numbers<[1], [0], [0], [1], [0, 0, 1, 1], [], []>} : vector<32x32xbf16>, vector<32x256xbf16>, vector<32x256xf32> -> vector<32x256xf32>
    %72 = arith.mulf %71, %71 : vector<32x256xf32>
    %73 = tpu.concatenate %71, %72 in 0 : vector<32x256xf32>, vector<32x256xf32> -> vector<64x256xf32>
    %cst_35 = arith.constant dense<0.000000e+00> : vector<64xf32>
    %74 = vector.multi_reduction <add>, %73, %cst_35 [1] : vector<64x256xf32> to vector<64xf32>
    %75 = vector.shape_cast %74 : vector<64xf32> to vector<64x1xf32>
    %76 = vector.extract_strided_slice %75 {offsets = [0, 0], sizes = [32, 1], strides = [1, 1]} : vector<64x1xf32> to vector<32x1xf32>
    %cst_36 = arith.constant 3.906250e-03 : f32
    %77 = vector.broadcast %cst_36 : f32 to vector<32x1xf32>
    %78 = arith.mulf %76, %77 : vector<32x1xf32>
    %79 = vector.extract_strided_slice %75 {offsets = [32, 0], sizes = [32, 1], strides = [1, 1]} : vector<64x1xf32> to vector<32x1xf32>
    %80 = arith.mulf %78, %78 : vector<32x1xf32>
    %cst_37 = arith.constant 2.560000e+02 : f32
    %81 = vector.broadcast %cst_37 : f32 to vector<32x1xf32>
    %82 = arith.mulf %80, %81 : vector<32x1xf32>
    %83 = arith.subf %79, %82 : vector<32x1xf32>
    %cst_38 = arith.constant 0.00392156886 : f32
    %84 = vector.broadcast %cst_38 : f32 to vector<32x1xf32>
    %85 = arith.mulf %83, %84 : vector<32x1xf32>
    %cst_39 = arith.constant 1.000000e-03 : f32
    %86 = vector.broadcast %cst_39 : f32 to vector<32x1xf32>
    %87 = arith.addf %85, %86 : vector<32x1xf32>
    %88 = math.rsqrt %87 : vector<32x1xf32>
    %c2 = arith.constant 2 : index
    %c0_40 = arith.constant 0 : index
    %c0_41 = arith.constant 0 : index
    %89 = vector.load %arg4[%c2, %c0_40, %c0_41] : memref<6x32x1xf32, #tpu.memory_space<vmem>>, vector<1x32x1xf32>
    %90 = vector.shape_cast %89 : vector<1x32x1xf32> to vector<32x1xf32>
    %91 = arith.mulf %88, %90 : vector<32x1xf32>
    %92 = vector.broadcast %78 : vector<32x1xf32> to vector<32x256xf32>
    %93 = arith.subf %71, %92 : vector<32x256xf32>
    %94 = vector.broadcast %91 : vector<32x1xf32> to vector<32x256xf32>
    %95 = arith.mulf %93, %94 : vector<32x256xf32>
    %c2_42 = arith.constant 2 : index
    %c0_43 = arith.constant 0 : index
    %c0_44 = arith.constant 0 : index
    %96 = vector.load %arg5[%c2_42, %c0_43, %c0_44] : memref<6x32x1xf32, #tpu.memory_space<vmem>>, vector<1x32x1xf32>
    %97 = vector.shape_cast %96 : vector<1x32x1xf32> to vector<32x1xf32>
    %98 = vector.broadcast %97 : vector<32x1xf32> to vector<32x256xf32>
    %99 = arith.addf %95, %98 : vector<32x256xf32>
    %cst_45 = arith.constant 0.000000e+00 : f32
    %100 = vector.broadcast %cst_45 : f32 to vector<32x256xf32>
    %101 = arith.maximumf %99, %100 : vector<32x256xf32>
    %c2_46 = arith.constant 2 : index
    %c0_47 = arith.constant 0 : index
    %c0_48 = arith.constant 0 : index
    %102 = vector.load %arg3[%c2_46, %c0_47, %c0_48] : memref<5x32x32xbf16, #tpu.memory_space<vmem>>, vector<1x32x32xbf16>
    %103 = vector.shape_cast %102 : vector<1x32x32xbf16> to vector<32x32xbf16>
    %104 = arith.truncf %101 : vector<32x256xf32> to vector<32x256xbf16>
    %cst_49 = arith.constant dense<0.000000e+00> : vector<32x256xf32>
    %105 = tpu.matmul %103, %104, %cst_49 {dimension_numbers = #tpu.dot_dimension_numbers<[1], [0], [0], [1], [0, 0, 1, 1], [], []>} : vector<32x32xbf16>, vector<32x256xbf16>, vector<32x256xf32> -> vector<32x256xf32>
    %106 = arith.mulf %105, %105 : vector<32x256xf32>
    %107 = tpu.concatenate %105, %106 in 0 : vector<32x256xf32>, vector<32x256xf32> -> vector<64x256xf32>
    %cst_50 = arith.constant dense<0.000000e+00> : vector<64xf32>
    %108 = vector.multi_reduction <add>, %107, %cst_50 [1] : vector<64x256xf32> to vector<64xf32>
    %109 = vector.shape_cast %108 : vector<64xf32> to vector<64x1xf32>
    %110 = vector.extract_strided_slice %109 {offsets = [0, 0], sizes = [32, 1], strides = [1, 1]} : vector<64x1xf32> to vector<32x1xf32>
    %cst_51 = arith.constant 3.906250e-03 : f32
    %111 = vector.broadcast %cst_51 : f32 to vector<32x1xf32>
    %112 = arith.mulf %110, %111 : vector<32x1xf32>
    %113 = vector.extract_strided_slice %109 {offsets = [32, 0], sizes = [32, 1], strides = [1, 1]} : vector<64x1xf32> to vector<32x1xf32>
    %114 = arith.mulf %112, %112 : vector<32x1xf32>
    %cst_52 = arith.constant 2.560000e+02 : f32
    %115 = vector.broadcast %cst_52 : f32 to vector<32x1xf32>
    %116 = arith.mulf %114, %115 : vector<32x1xf32>
    %117 = arith.subf %113, %116 : vector<32x1xf32>
    %cst_53 = arith.constant 0.00392156886 : f32
    %118 = vector.broadcast %cst_53 : f32 to vector<32x1xf32>
    %119 = arith.mulf %117, %118 : vector<32x1xf32>
    %cst_54 = arith.constant 1.000000e-03 : f32
    %120 = vector.broadcast %cst_54 : f32 to vector<32x1xf32>
    %121 = arith.addf %119, %120 : vector<32x1xf32>
    %122 = math.rsqrt %121 : vector<32x1xf32>
    %c3 = arith.constant 3 : index
    %c0_55 = arith.constant 0 : index
    %c0_56 = arith.constant 0 : index
    %123 = vector.load %arg4[%c3, %c0_55, %c0_56] : memref<6x32x1xf32, #tpu.memory_space<vmem>>, vector<1x32x1xf32>
    %124 = vector.shape_cast %123 : vector<1x32x1xf32> to vector<32x1xf32>
    %125 = arith.mulf %122, %124 : vector<32x1xf32>
    %126 = vector.broadcast %112 : vector<32x1xf32> to vector<32x256xf32>
    %127 = arith.subf %105, %126 : vector<32x256xf32>
    %128 = vector.broadcast %125 : vector<32x1xf32> to vector<32x256xf32>
    %129 = arith.mulf %127, %128 : vector<32x256xf32>
    %c3_57 = arith.constant 3 : index
    %c0_58 = arith.constant 0 : index
    %c0_59 = arith.constant 0 : index
    %130 = vector.load %arg5[%c3_57, %c0_58, %c0_59] : memref<6x32x1xf32, #tpu.memory_space<vmem>>, vector<1x32x1xf32>
    %131 = vector.shape_cast %130 : vector<1x32x1xf32> to vector<32x1xf32>
    %132 = vector.broadcast %131 : vector<32x1xf32> to vector<32x256xf32>
    %133 = arith.addf %129, %132 : vector<32x256xf32>
    %cst_60 = arith.constant 0.000000e+00 : f32
    %134 = vector.broadcast %cst_60 : f32 to vector<32x256xf32>
    %135 = arith.maximumf %133, %134 : vector<32x256xf32>
    %c3_61 = arith.constant 3 : index
    %c0_62 = arith.constant 0 : index
    %c0_63 = arith.constant 0 : index
    %136 = vector.load %arg3[%c3_61, %c0_62, %c0_63] : memref<5x32x32xbf16, #tpu.memory_space<vmem>>, vector<1x32x32xbf16>
    %137 = vector.shape_cast %136 : vector<1x32x32xbf16> to vector<32x32xbf16>
    %138 = arith.truncf %135 : vector<32x256xf32> to vector<32x256xbf16>
    %cst_64 = arith.constant dense<0.000000e+00> : vector<32x256xf32>
    %139 = tpu.matmul %137, %138, %cst_64 {dimension_numbers = #tpu.dot_dimension_numbers<[1], [0], [0], [1], [0, 0, 1, 1], [], []>} : vector<32x32xbf16>, vector<32x256xbf16>, vector<32x256xf32> -> vector<32x256xf32>
    %140 = arith.mulf %139, %139 : vector<32x256xf32>
    %141 = tpu.concatenate %139, %140 in 0 : vector<32x256xf32>, vector<32x256xf32> -> vector<64x256xf32>
    %cst_65 = arith.constant dense<0.000000e+00> : vector<64xf32>
    %142 = vector.multi_reduction <add>, %141, %cst_65 [1] : vector<64x256xf32> to vector<64xf32>
    %143 = vector.shape_cast %142 : vector<64xf32> to vector<64x1xf32>
    %144 = vector.extract_strided_slice %143 {offsets = [0, 0], sizes = [32, 1], strides = [1, 1]} : vector<64x1xf32> to vector<32x1xf32>
    %cst_66 = arith.constant 3.906250e-03 : f32
    %145 = vector.broadcast %cst_66 : f32 to vector<32x1xf32>
    %146 = arith.mulf %144, %145 : vector<32x1xf32>
    %147 = vector.extract_strided_slice %143 {offsets = [32, 0], sizes = [32, 1], strides = [1, 1]} : vector<64x1xf32> to vector<32x1xf32>
    %148 = arith.mulf %146, %146 : vector<32x1xf32>
    %cst_67 = arith.constant 2.560000e+02 : f32
    %149 = vector.broadcast %cst_67 : f32 to vector<32x1xf32>
    %150 = arith.mulf %148, %149 : vector<32x1xf32>
    %151 = arith.subf %147, %150 : vector<32x1xf32>
    %cst_68 = arith.constant 0.00392156886 : f32
    %152 = vector.broadcast %cst_68 : f32 to vector<32x1xf32>
    %153 = arith.mulf %151, %152 : vector<32x1xf32>
    %cst_69 = arith.constant 1.000000e-03 : f32
    %154 = vector.broadcast %cst_69 : f32 to vector<32x1xf32>
    %155 = arith.addf %153, %154 : vector<32x1xf32>
    %156 = math.rsqrt %155 : vector<32x1xf32>
    %c4 = arith.constant 4 : index
    %c0_70 = arith.constant 0 : index
    %c0_71 = arith.constant 0 : index
    %157 = vector.load %arg4[%c4, %c0_70, %c0_71] : memref<6x32x1xf32, #tpu.memory_space<vmem>>, vector<1x32x1xf32>
    %158 = vector.shape_cast %157 : vector<1x32x1xf32> to vector<32x1xf32>
    %159 = arith.mulf %156, %158 : vector<32x1xf32>
    %160 = vector.broadcast %146 : vector<32x1xf32> to vector<32x256xf32>
    %161 = arith.subf %139, %160 : vector<32x256xf32>
    %162 = vector.broadcast %159 : vector<32x1xf32> to vector<32x256xf32>
    %163 = arith.mulf %161, %162 : vector<32x256xf32>
    %c4_72 = arith.constant 4 : index
    %c0_73 = arith.constant 0 : index
    %c0_74 = arith.constant 0 : index
    %164 = vector.load %arg5[%c4_72, %c0_73, %c0_74] : memref<6x32x1xf32, #tpu.memory_space<vmem>>, vector<1x32x1xf32>
    %165 = vector.shape_cast %164 : vector<1x32x1xf32> to vector<32x1xf32>
    %166 = vector.broadcast %165 : vector<32x1xf32> to vector<32x256xf32>
    %167 = arith.addf %163, %166 : vector<32x256xf32>
    %cst_75 = arith.constant 0.000000e+00 : f32
    %168 = vector.broadcast %cst_75 : f32 to vector<32x256xf32>
    %169 = arith.maximumf %167, %168 : vector<32x256xf32>
    %c4_76 = arith.constant 4 : index
    %c0_77 = arith.constant 0 : index
    %c0_78 = arith.constant 0 : index
    %170 = vector.load %arg3[%c4_76, %c0_77, %c0_78] : memref<5x32x32xbf16, #tpu.memory_space<vmem>>, vector<1x32x32xbf16>
    %171 = vector.shape_cast %170 : vector<1x32x32xbf16> to vector<32x32xbf16>
    %172 = arith.truncf %169 : vector<32x256xf32> to vector<32x256xbf16>
    %cst_79 = arith.constant dense<0.000000e+00> : vector<32x256xf32>
    %173 = tpu.matmul %171, %172, %cst_79 {dimension_numbers = #tpu.dot_dimension_numbers<[1], [0], [0], [1], [0, 0, 1, 1], [], []>} : vector<32x32xbf16>, vector<32x256xbf16>, vector<32x256xf32> -> vector<32x256xf32>
    %174 = arith.mulf %173, %173 : vector<32x256xf32>
    %175 = tpu.concatenate %173, %174 in 0 : vector<32x256xf32>, vector<32x256xf32> -> vector<64x256xf32>
    %cst_80 = arith.constant dense<0.000000e+00> : vector<64xf32>
    %176 = vector.multi_reduction <add>, %175, %cst_80 [1] : vector<64x256xf32> to vector<64xf32>
    %177 = vector.shape_cast %176 : vector<64xf32> to vector<64x1xf32>
    %178 = vector.extract_strided_slice %177 {offsets = [0, 0], sizes = [32, 1], strides = [1, 1]} : vector<64x1xf32> to vector<32x1xf32>
    %cst_81 = arith.constant 3.906250e-03 : f32
    %179 = vector.broadcast %cst_81 : f32 to vector<32x1xf32>
    %180 = arith.mulf %178, %179 : vector<32x1xf32>
    %181 = vector.extract_strided_slice %177 {offsets = [32, 0], sizes = [32, 1], strides = [1, 1]} : vector<64x1xf32> to vector<32x1xf32>
    %182 = arith.mulf %180, %180 : vector<32x1xf32>
    %cst_82 = arith.constant 2.560000e+02 : f32
    %183 = vector.broadcast %cst_82 : f32 to vector<32x1xf32>
    %184 = arith.mulf %182, %183 : vector<32x1xf32>
    %185 = arith.subf %181, %184 : vector<32x1xf32>
    %cst_83 = arith.constant 0.00392156886 : f32
    %186 = vector.broadcast %cst_83 : f32 to vector<32x1xf32>
    %187 = arith.mulf %185, %186 : vector<32x1xf32>
    %cst_84 = arith.constant 1.000000e-03 : f32
    %188 = vector.broadcast %cst_84 : f32 to vector<32x1xf32>
    %189 = arith.addf %187, %188 : vector<32x1xf32>
    %190 = math.rsqrt %189 : vector<32x1xf32>
    %c5 = arith.constant 5 : index
    %c0_85 = arith.constant 0 : index
    %c0_86 = arith.constant 0 : index
    %191 = vector.load %arg4[%c5, %c0_85, %c0_86] : memref<6x32x1xf32, #tpu.memory_space<vmem>>, vector<1x32x1xf32>
    %192 = vector.shape_cast %191 : vector<1x32x1xf32> to vector<32x1xf32>
    %193 = arith.mulf %190, %192 : vector<32x1xf32>
    %194 = vector.broadcast %180 : vector<32x1xf32> to vector<32x256xf32>
    %195 = arith.subf %173, %194 : vector<32x256xf32>
    %196 = vector.broadcast %193 : vector<32x1xf32> to vector<32x256xf32>
    %197 = arith.mulf %195, %196 : vector<32x256xf32>
    %c5_87 = arith.constant 5 : index
    %c0_88 = arith.constant 0 : index
    %c0_89 = arith.constant 0 : index
    %198 = vector.load %arg5[%c5_87, %c0_88, %c0_89] : memref<6x32x1xf32, #tpu.memory_space<vmem>>, vector<1x32x1xf32>
    %199 = vector.shape_cast %198 : vector<1x32x1xf32> to vector<32x1xf32>
    %200 = vector.broadcast %199 : vector<32x1xf32> to vector<32x256xf32>
    %201 = arith.addf %197, %200 : vector<32x256xf32>
    %cst_90 = arith.constant 0.000000e+00 : f32
    %202 = vector.broadcast %cst_90 : f32 to vector<32x256xf32>
    %203 = arith.maximumf %201, %202 : vector<32x256xf32>
    %c0_91 = arith.constant 0 : index
    %c0_92 = arith.constant 0 : index
    %c0_93 = arith.constant 0 : index
    %204 = vector.load %arg6[%c0_91, %c0_92, %c0_93] : memref<1x32x256xf32, #tpu.memory_space<vmem>>, vector<1x32x256xf32>
    %205 = vector.shape_cast %204 : vector<1x32x256xf32> to vector<32x256xf32>
    %206 = vector.shape_cast %203 : vector<32x256xf32> to vector<1x32x256xf32>
    tpu.vector_store %arg6[%c0_91, %c0_92, %c0_93], %206 {strides = array<i32>} : memref<1x32x256xf32, #tpu.memory_space<vmem>>, vector<1x32x256xf32>,
    return
  }
  func.func @transform_0(%arg0: i32) -> (i32, i32, i32) {
    %c0_i32 = arith.constant 0 : i32
    %c0_i32_0 = arith.constant 0 : i32
    %c0_i32_1 = arith.constant 0 : i32
    return %arg0, %c0_i32, %c0_i32_0 : i32, i32, i32
  }
  func.func @transform_1(%arg0: i32) -> (i32, i32) {
    %c0_i32 = arith.constant 0 : i32
    %c0_i32_0 = arith.constant 0 : i32
    %c0_i32_1 = arith.constant 0 : i32
    return %c0_i32, %c0_i32_0 : i32, i32
  }
  func.func @transform_2(%arg0: i32) -> (i32, i32, i32) {
    %c0_i32 = arith.constant 0 : i32
    %c0_i32_0 = arith.constant 0 : i32
    %c0_i32_1 = arith.constant 0 : i32
    %c0_i32_2 = arith.constant 0 : i32
    return %c0_i32, %c0_i32_0, %c0_i32_1 : i32, i32, i32
  }
  func.func @transform_3(%arg0: i32) -> (i32, i32, i32) {
    %c0_i32 = arith.constant 0 : i32
    %c0_i32_0 = arith.constant 0 : i32
    %c0_i32_1 = arith.constant 0 : i32
    %c0_i32_2 = arith.constant 0 : i32
    return %c0_i32, %c0_i32_0, %c0_i32_1 : i32, i32, i32
  }
  func.func @transform_4(%arg0: i32) -> (i32, i32, i32) {
    %c0_i32 = arith.constant 0 : i32
    %c0_i32_0 = arith.constant 0 : i32
    %c0_i32_1 = arith.constant 0 : i32
    %c0_i32_2 = arith.constant 0 : i32
    return %c0_i32, %c0_i32_0, %c0_i32_1 : i32, i32, i32
  }
  func.func @transform_5(%arg0: i32) -> (i32, i32, i32) {
    %c0_i32 = arith.constant 0 : i32
    %c0_i32_0 = arith.constant 0 : i32
    %c0_i32_1 = arith.constant 0 : i32
    return %arg0, %c0_i32, %c0_i32_0 : i32, i32, i32
  }
}

</mosaic_0001>

<bundles_post_ra>
// kernel: tpu_custom_call.1
= control target key start
LH: loop header
LB: loop body
LE: loop exit
PB: predicated region body
PF: predicated region fallthrough
CT: control target
= control target key end

     0   :  { %10 = vsyncpa [#allocation3], 0  ;;  %s2811_s0 = inlined_call_operand.vmem [shape: bf16[2,6,256], index: 0, kind: input, shape index: {}]   ;;  %s2812_s1 = inlined_call_operand.vmem [shape: bf16[32,6], index: 1, kind: input, shape index: {}]   ;;  %s2813_s2 = inlined_call_operand.vmem [shape: bf16[5,32,32], index: 2, kind: input, shape index: {}]   ;;  %s2814_s3 = inlined_call_operand.vmem [shape: f32[6,32,1], index: 3, kind: input, shape index: {}]   ;;  %s2815_s4 = inlined_call_operand.vmem [shape: f32[6,32,1], index: 4, kind: input, shape index: {}]   ;;  %s2816_s5 = inlined_call_operand.hbm [shape: f32[2,32,256], index: 5, kind: output, shape index: {}]  }
   0x1   :  { %12 = vsyncpa [#allocation3 + $0x1], 0  ;;  %s1960_s18 = smov 0   ;;  %s1962_s19 = smov 0  }
   0x2   :  { %s1964_s20 = smov 0   ;;  %s1966_s21 = smov 0  }
   0x3 LB: > { %s1981_s22 = sadd.s32 4294967295, %s1924_s21   ;;  %s1659_s23 = sadd.s32 4294967294, %s1924_s21   ;;  %s1924_s21 = sphi %s1966_s21, %s2822_s21   ;;  %s1920_s20 = sphi %s1964_s20, %s2821_s20   ;;  %s1916_s19 = sphi %s1962_s19, %s2820_s19   ;;  %s1912_s18 = sphi %s1960_s18, %s2819_s18  }
   0x4   : > { %s1985_s24 = sadd.s32 1, %s1924_s21   ;;  %s135_s25 = sadd.s32 1, %s1920_s20 }
   0x5   : > { %s132_s26 = ssub.s32 %s1924_s21, %s1985_s24  ;;  %p145_p0 = scmp.ne.s32.totalorder %s1920_s20, %s1916_s19 }
   0x6   : > { %p133_p1 = scmp.eq.s32.totalorder %s132_s26, 0  ;;  %p146_p2 = scmp.eq.s32.totalorder %s1981_s22, 1 }
   0x7   : > { %p151_p3 = scmp.ne.s32.totalorder %s1916_s19, %s1912_s18  ;;  %p152_p4 = scmp.eq.s32.totalorder %s1659_s23, 1 }
   0x8   : > { %s1996_s27 = scalar_select %p133_p1, %s1920_s20, %s135_s25  }
   0x9   : > { %p1998_p5 = por %p146_p2, %p145_p0  ;;  %p2002_p6 = por %p152_p4, %p151_p3 }
   0xa   : > { %p1662_p7 = scmp.ge.s32.totalorder %s1924_s21, 1  ;;  %p190_p8 = scmp.lt.s32.totalorder %s1924_s21, 3 }
   0xc   : > { %p191_p9 = pnand %p1662_p7, %p190_p8 }
   0xd   : > { %p218_p10 = scmp.lt.s32.totalorder (!%p191_p9), %s1981_s22, 1  ;;  %v1926_v0 = vmov (!%p191_p9), 0   ;;  %vm251_vm0 = vcmask (!%p191_p9), 1042432   ;;  %v1802_v5 = vld [vmem:[%s2812_s1] sm:$0xff] (!%p191_p9)   ;;  %vm244_vm1 = vcmask (!%p191_p9), 48128   ;;  %v1803_v6 = vld [vmem:[%s2812_s1 + $0x8] sm:$0xff] (!%p191_p9)  }
   0xe   : > { %194 = sbr.rel (%p191_p9) target bundleno = 3264 (0xcc0), region = 40  ;;  %290 = vmatprep.mubr.bf16.mxu0 (!%p191_p9), %v1926_v0  ;;  %1799 = vset.pattern.permute.xlu1 (!%p191_p9), %v1926_v0  ;;  %v415_v31 = vld [vmem:[%s2815_s4] sm:$0xff] (!%p191_p9)  ;;  %v416_v32 = vld [vmem:[%s2815_s4 + $0x8] sm:$0xff] (!%p191_p9)  ;;  %v417_v33 = vld [vmem:[%s2815_s4 + $0x10] sm:$0xff] (!%p191_p9)  ;;  %vm473_vm2 = vcmask (!%p191_p9), 261120   ;;  %s215_s23 = sand.u32 (!%p191_p9), 1, %s1916_s19  }
   0xf   : > { %1798 = vset.pattern.permute.xlu0 (!%p191_p9), %v1926_v0  ;;  %512 = vmatprep.mubr.bf16.mxu1 (!%p191_p9), %v1926_v0  ;;  %s1663_s25 = sshll.u32 (!%p191_p9), %s215_s23, 6  ;;  %s1927_s11 = smov (!%p191_p9), [#allocation2]  }
  0x10   : > { %s217_s26 = scalar_lea.vmem (!%p191_p9), [#allocation2], %s1663_s25  ;;  %s1866_s12 = sshll.u32 (!%p191_p9), %s1927_s11, 4  ;;  %s1867_s12 = int_to_ptr.vmem [resolvable:$false] %s1866_s12 }
  0x11   : > { %s1868_s13 = scalar_lea.vmem (!%p191_p9), %s1867_s12, 2048 }
  0x15   : > { %s219_s30 = scalar_select %p218_p10, %s1981_s22, 1 }
  0x17   : > { %s1754_s6 = sshll.u32 %s219_s30, 3  ;;  %s1755_s30 = sshll.u32 %s1981_s22, 10 }
  0x18   : > { %s222_s9 = scalar_lea.vmem %s2811_s0, %s1754_s6  ;;  %s1597_s6 = sshll.u32 %s217_s26, 4  ;;  %s2766_s6 = int_to_ptr.vmem [resolvable:$true] %s1597_s6 }
  0x19   : > { %v228_v1 = vld [vmem:[%s222_s9] sm:$0x77]  ;;  %s2764_s9 = scalar_lea.hbm %s2816_s5, %s1755_s30  ;;  %s2770_s22 = scalar_lea.sflag [#allocation3], %s215_s23 }
  0x1a   : > { %v1669_v2 = vcombine.high %v228_v1, %v228_v1  ;;  %v1668_v3 = vcombine.low %v228_v1, %v228_v1  ;;  %s1862_s10 = scalar_lea.vmem %s2766_s6, 1024  ;;  %p1869_p0 = scmp.lt.s32.totalorder %s2766_s6, %s1867_s12 }
  0x1b   : > { %p1863_p11 = scmp.ne.s32.totalorder %s2766_s6, %s1862_s10  ;;  %p1870_p1 = scmp.lt.s32.totalorder %s1868_s13, %s1862_s10 }
  0x1c   : > { %1670 = vmatprep.subr.msk.bf16.mxu0 %vm251_vm0, %v1669_v2  ;;  %v253_v4 = vsel %vm251_vm0, %v1668_v3, 0 }
  0x1d   : > { %259 = vmatpush1.bf16.msra.mxu0 %v253_v4  ;;  %p1864_p12 = pnand %p1863_p11, %p1998_p5  ;;  %p1871_p2 = por %p1870_p1, %p1869_p0 }
  0x1f   : > { %p1865_p13 = pneg %p1864_p12 }
  0x20   : > { %1671 = vmatmul.mubr.msk.bf16.vlgmr.msra.gmra.mrb[0].mxu0 %vm244_vm1, %v1802_v5 }
  0x21   : > { %300 = vmatprep.mubr.bf16.mxu0 %v1926_v0  ;;  %p1872_p3 = pnand %p1871_p2, %p1865_p13 }
  0x28   : > { %1672 = vmatmul.mubr.msk.bf16.gmra.mrb[4].mxu0 %vm244_vm1, %v1803_v6 }
  0x29   : > { %736 = vmatprep.mubr.bf16.mxu0 %v1926_v0 }
  0xf3   : > { %v2025_v7 = vpop.f32.mrb[0].mxu0 }
  0xf4   : > { %v2027_v8 = vpop.f32.mrb[1].mxu0  ;;  %v311_v9 = vmul.f32 %v2025_v7, %v2025_v7 }
  0xf5   : > { %v2031_v10 = vpop.f32.mrb[2].mxu0  ;;  %v319_v11 = vadd.f32 %v2027_v8, %v2025_v7  ;;  %v312_v12 = vmul.f32 %v2027_v8, %v2027_v8 }
  0xf6   : > { %v2037_v13 = vpop.f32.mrb[3].mxu0  ;;  %v313_v14 = vmul.f32 %v2031_v10, %v2031_v10 }
  0xf7   : > { %320 = vadd.xlane.f32.xlu0 %v319_v11  ;;  %v322_v15 = vadd.f32 %v2037_v13, %v2031_v10  ;;  %v331_v16 = vadd.f32 %v312_v12, %v311_v9  ;;  %v314_v17 = vmul.f32 %v2037_v13, %v2037_v13  ;;  %v371_v12 = vld [vmem:[%s2814_s3] sm:$0xff] }
  0xf9   : > { %v334_v18 = vadd.f32 %v314_v17, %v313_v14 }
  0xfb   : > { %323 = vadd.xlane.f32.xlu0 %v322_v15  ;;  %v2045_v19 = vpop.f32.mrb[4].mxu0 }
  0xfc   : > { %v2047_v20 = vpop.f32.mrb[5].mxu0  ;;  %v315_v21 = vmul.f32 %v2045_v19, %v2045_v19 }
  0xfd   : > { %v2051_v22 = vpop.f32.mrb[6].mxu0  ;;  %v325_v23 = vadd.f32 %v2047_v20, %v2045_v19  ;;  %v316_v24 = vmul.f32 %v2047_v20, %v2047_v20 }
  0xfe   : > { %v2057_v25 = vpop.f32.mrb[7].mxu0  ;;  %v317_v26 = vmul.f32 %v2051_v22, %v2051_v22 }
  0xff   : > { %332 = vadd.xlane.f32.xlu0 %v331_v16  ;;  %326 = vadd.xlane.f32.xlu1 %v325_v23  ;;  %v337_v27 = vadd.f32 %v316_v24, %v315_v21  ;;  %v328_v28 = vadd.f32 %v2057_v25, %v2051_v22  ;;  %v318_v29 = vmul.f32 %v2057_v25, %v2057_v25  ;;  %v372_v16 = vld [vmem:[%s2814_s3 + $0x8] sm:$0xff] }
 0x101   : > { %v340_v30 = vadd.f32 %v318_v29, %v317_v26 }
 0x103   : > { %338 = vadd.xlane.f32.xlu0 %v337_v27  ;;  %329 = vadd.xlane.f32.xlu1 %v328_v28  ;;  %v418_v27 = vld [vmem:[%s2815_s4 + $0x18] sm:$0xff] }
 0x107   : > { %335 = vadd.xlane.f32.xlu1 %v334_v18 }
 0x10b   : > { %341 = vadd.xlane.f32.xlu1 %v340_v30 }
 0x11c   : > { %421 = vperm.xlu1 %1799, %v415_v31  }
 0x120   : > { %426 = vperm.xlu1 %1799, %v416_v32  }
 0x124   : > { %431 = vperm.xlu1 %1799, %v417_v33  }
 0x184   : > { %v321_v34 = vpop.xlane.xlu0 %320 }
 0x185   : > { %v2074_v35 = vmul.f32 0.00390625, %v321_v34 }
 0x187   : > { %v347_v36 = vmul.f32 %v2074_v35, %v2074_v35  ;;  %v379_v37 = vsub.f32 %v2025_v7, %v2074_v35  ;;  %v380_v38 = vsub.f32 %v2027_v8, %v2074_v35 }
 0x188   : > { %v324_v39 = vpop.xlane.xlu0 %323 }
 0x189   : > { %v2082_v40 = vmul.f32 0.00390625, %v324_v39  ;;  %v351_v41 = vmul.f32 256.0, %v347_v36 }
 0x18b   : > { %v381_v42 = vsub.f32 %v2031_v10, %v2082_v40  ;;  %v382_v43 = vsub.f32 %v2037_v13, %v2082_v40  ;;  %v348_v48 = vmul.f32 %v2082_v40, %v2082_v40 }
 0x18c   : > { %v333_v44 = vpop.xlane.xlu0 %332  ;;  %v327_v45 = vpop.xlane.xlu1 %326 }
 0x18d   : > { %v355_v46 = vsub.f32 %v333_v44, %v351_v41  ;;  %v2088_v47 = vmul.f32 0.00390625, %v327_v45  ;;  %v352_v58 = vmul.f32 256.0, %v348_v48 }
 0x18f   : > { %v359_v49 = vmul.f32 0.003921569, %v355_v46  ;;  %v349_v50 = vmul.f32 %v2088_v47, %v2088_v47  ;;  %v383_v51 = vsub.f32 %v2045_v19, %v2088_v47  ;;  %v384_v52 = vsub.f32 %v2047_v20, %v2088_v47  ;;  %v1804_v20 = vld [vmem:[%s2813_s2] sm:$0xff]   ;;  %v1805_v47 = vld [vmem:[%s2813_s2 + $0x8] sm:$0xff]  }
 0x190   : > { %v330_v53 = vpop.xlane.xlu1 %329  ;;  %v339_v57 = vpop.xlane.xlu0 %338 }
 0x191   : > { %v363_v54 = vadd.f32 0.001, %v359_v49  ;;  %v353_v55 = vmul.f32 256.0, %v349_v50  ;;  %v2098_v56 = vmul.f32 0.00390625, %v330_v53 }
 0x193   : > { %1814 = vrsqrt.f32 %v363_v54  ;;  %v357_v59 = vsub.f32 %v339_v57, %v353_v55  ;;  %v350_v60 = vmul.f32 %v2098_v56, %v2098_v56  ;;  %v385_v61 = vsub.f32 %v2051_v22, %v2098_v56  ;;  %v373_v22 = vld [vmem:[%s2814_s3 + $0x10] sm:$0xff] }
 0x194   : > { %v336_v62 = vpop.xlane.xlu1 %335  ;;  %v386_v63 = vsub.f32 %v2057_v25, %v2098_v56  ;;  %v374_v25 = vld [vmem:[%s2814_s3 + $0x18] sm:$0xff] }
 0x195   : > { %v361_v1 = vmul.f32 0.003921569, %v357_v59  ;;  %v356_v2 = vsub.f32 %v336_v62, %v352_v58  ;;  %v354_v4 = vmul.f32 256.0, %v350_v60 }
 0x197   : > { %v360_v3 = vmul.f32 0.003921569, %v356_v2  ;;  %v365_v6 = vadd.f32 0.001, %v361_v1 }
 0x198   : > { %v342_v5 = vpop.xlane.xlu1 %341 }
 0x199   : > { %v364_v9 = vadd.f32 0.001, %v360_v3  ;;  %v358_v10 = vsub.f32 %v342_v5, %v354_v4 }
 0x19b   : > { %1816 = vrsqrt.f32 %v364_v9  ;;  %v362_v11 = vmul.f32 0.003921569, %v358_v10 }
 0x19c   : > { %1818 = vrsqrt.f32 %v365_v6  ;;  %v422_v28 = vpop.permute.xlu1 %421 }
 0x19d   : > { %v1815_v13 = vpop.eup %1814  ;;  %v366_v14 = vadd.f32 0.001, %v362_v11 }
 0x19e   : > { %v375_v15 = vmul.f32 %v1815_v13, %v371_v12 }
 0x19f   : > { %1820 = vrsqrt.f32 %v366_v14 }
 0x1a0   : > { %389 = vperm.xlu0 %1798, %v375_v15   ;;  %v427_v29 = vpop.permute.xlu1 %426 }
 0x1a4   : > { %v432_v31 = vpop.permute.xlu1 %431 }
 0x1a5   : > { %v1817_v17 = vpop.eup %1816 }
 0x1a6   : > { %v376_v18 = vmul.f32 %v1817_v17, %v372_v16  ;;  %v1819_v21 = vpop.eup %1818 }
 0x1a7   : > { %v377_v23 = vmul.f32 %v1819_v21, %v373_v22 }
 0x1a8   : > { %394 = vperm.xlu1 %1799, %v376_v18  }
 0x1a9   : > { %v1821_v24 = vpop.eup %1820 }
 0x1aa   : > { %v378_v26 = vmul.f32 %v1821_v24, %v374_v25 }
 0x1ac   : > { %399 = vperm.xlu1 %1799, %v377_v23  }
 0x1b0   : > { %404 = vperm.xlu1 %1799, %v378_v26  }
 0x1b4   : > { %436 = vperm.xlu1 %1799, %v418_v27   ;;  %v1681_v27 = vld [vmem:[%s2815_s4 + $0x20] sm:$0xff] }
 0x21f   : > { %v390_v30 = vpop.permute.xlu0 %389 }
 0x220   : > { %v407_v32 = vmul.f32 %v390_v30, %v379_v37  ;;  %v408_v33 = vmul.f32 %v390_v30, %v380_v38 }
 0x222   : > { %v439_v36 = vadd.f32 %v422_v28, %v407_v32  ;;  %v440_v41 = vadd.f32 %v422_v28, %v408_v33  ;;  %v1682_v28 = vld [vmem:[%s2815_s4 + $0x28] sm:$0xff] }
 0x224   : > { %v448_v48 = vmax.f32 %v440_v41, 0.0  ;;  %v447_v50 = vmax.f32 %v439_v36, 0.0 }
 0x227   : > { %v395_v34 = vpop.permute.xlu1 %394 }
 0x228   : > { %v409_v39 = vmul.f32 %v395_v34, %v381_v42  ;;  %v410_v40 = vmul.f32 %v395_v34, %v382_v43 }
 0x22a   : > { %v441_v44 = vadd.f32 %v427_v29, %v409_v39  ;;  %v442_v45 = vadd.f32 %v427_v29, %v410_v40 }
 0x22b   : > { %v400_v46 = vpop.permute.xlu1 %399 }
 0x22c   : > { %v450_v49 = vmax.f32 %v442_v45, 0.0  ;;  %v449_v53 = vmax.f32 %v441_v44, 0.0  ;;  %v411_v7 = vmul.f32 %v400_v46, %v383_v51  ;;  %v412_v8 = vmul.f32 %v400_v46, %v384_v52 }
 0x22e   : > { %v460_v35 = vpack.c.bf16 %v450_v49, %v448_v48  ;;  %v459_v37 = vpack.c.bf16 %v449_v53, %v447_v50  ;;  %v443_v42 = vadd.f32 %v432_v31, %v411_v7  ;;  %v444_v43 = vadd.f32 %v432_v31, %v412_v8 }
 0x22f   : > { %v405_v38 = vpop.permute.xlu1 %404 }
 0x230   : > { %480 = vmatprep.subr.bf16.mxu1 %v460_v35  ;;  %v413_v54 = vmul.f32 %v405_v38, %v385_v61  ;;  %v414_v55 = vmul.f32 %v405_v38, %v386_v63  ;;  %v451_v59 = vmax.f32 %v443_v42, 0.0  ;;  %v452_v60 = vmax.f32 %v444_v43, 0.0 }
 0x231   : > { %481 = vmatpush1.bf16.msra.mxu1 %v459_v37 }
 0x233   : > { %v437_v56 = vpop.permute.xlu1 %436 }
 0x234   : > { %v445_v57 = vadd.f32 %v437_v56, %v413_v54  ;;  %v446_v58 = vadd.f32 %v437_v56, %v414_v55 }
 0x236   : > { %v453_v19 = vmax.f32 %v445_v57, 0.0  ;;  %v454_v51 = vmax.f32 %v446_v58, 0.0 }
 0x238   : > { %v462_v62 = vpack.c.bf16 %v454_v51, %v452_v60  ;;  %v461_v1 = vpack.c.bf16 %v453_v19, %v451_v59 }
 0x23a   : > { %482 = vmatprep.subr.bf16.mxu1 %v462_v62 }
 0x23b   : > { %483 = vmatpush1.bf16.msra.mxu1 %v461_v1 }
 0x23e   : > { %1675 = vmatmul.mubr.msk.bf16.vlgmr.msra.gmra.mrb[0].mxu1 %vm473_vm2, %v1804_v20 }
 0x23f   : > { %522 = vmatprep.mubr.bf16.mxu1 %v1926_v0 }
 0x246   : > { %1676 = vmatmul.mubr.msk.bf16.gmra.mrb[4].mxu1 %vm473_vm2, %v1805_v47 }
 0x247   : > { %960 = vmatprep.mubr.bf16.mxu1 %v1926_v0 }
 0x311   : > { %v2143_v52 = vpop.f32.mrb[0].mxu1 }
 0x312   : > { %v2145_v61 = vpop.f32.mrb[1].mxu1  ;;  %v533_v63 = vmul.f32 %v2143_v52, %v2143_v52 }
 0x313   : > { %v2149_v2 = vpop.f32.mrb[2].mxu1  ;;  %v541_v3 = vadd.f32 %v2145_v61, %v2143_v52  ;;  %v534_v4 = vmul.f32 %v2145_v61, %v2145_v61 }
 0x314   : > { %v2155_v5 = vpop.f32.mrb[3].mxu1  ;;  %v535_v6 = vmul.f32 %v2149_v2, %v2149_v2 }
 0x315   : > { %542 = vadd.xlane.f32.xlu1 %v541_v3  ;;  %v544_v9 = vadd.f32 %v2155_v5, %v2149_v2  ;;  %v553_v10 = vadd.f32 %v534_v4, %v533_v63  ;;  %v536_v11 = vmul.f32 %v2155_v5, %v2155_v5 }
 0x317   : > { %545 = vadd.xlane.f32.xlu0 %v544_v9  ;;  %v556_v12 = vadd.f32 %v536_v11, %v535_v6  ;;  %v1677_v6 = vld [vmem:[%s2814_s3 + $0x20] sm:$0xff] }
 0x319   : > { %v2163_v13 = vpop.f32.mrb[4].mxu1 }
 0x31a   : > { %v2165_v14 = vpop.f32.mrb[5].mxu1  ;;  %v537_v15 = vmul.f32 %v2163_v13, %v2163_v13 }
 0x31b   : > { %v2169_v16 = vpop.f32.mrb[6].mxu1  ;;  %v547_v17 = vadd.f32 %v2165_v14, %v2163_v13  ;;  %v538_v18 = vmul.f32 %v2165_v14, %v2165_v14 }
 0x31c   : > { %v2175_v21 = vpop.f32.mrb[7].mxu1  ;;  %v539_v22 = vmul.f32 %v2169_v16, %v2169_v16 }
 0x31d   : > { %548 = vadd.xlane.f32.xlu0 %v547_v17  ;;  %v550_v23 = vadd.f32 %v2175_v21, %v2169_v16  ;;  %v559_v24 = vadd.f32 %v538_v18, %v537_v15  ;;  %v540_v25 = vmul.f32 %v2175_v21, %v2175_v21  ;;  %v1679_v17 = vld [vmem:[%s2814_s3 + $0x30] sm:$0xff]  ;;  %v1680_v18 = vld [vmem:[%s2814_s3 + $0x38] sm:$0xff] }
 0x31f   : > { %551 = vadd.xlane.f32.xlu1 %v550_v23  ;;  %v562_v26 = vadd.f32 %v540_v25, %v539_v22  ;;  %v1684_v25 = vld [vmem:[%s2815_s4 + $0x38] sm:$0xff] }
 0x321   : > { %554 = vadd.xlane.f32.xlu0 %v553_v10  ;;  %v1678_v10 = vld [vmem:[%s2814_s3 + $0x28] sm:$0xff] }
 0x323   : > { %557 = vadd.xlane.f32.xlu1 %v556_v12 }
 0x325   : > { %560 = vadd.xlane.f32.xlu0 %v559_v24  ;;  %v1683_v24 = vld [vmem:[%s2815_s4 + $0x30] sm:$0xff] }
 0x327   : > { %563 = vadd.xlane.f32.xlu1 %v562_v26 }
 0x338   : > { %645 = vperm.xlu1 %1799, %v1681_v27  }
 0x33b   : > { %650 = vperm.xlu0 %1798, %v1682_v28  }
 0x3a2   : > { %v543_v29 = vpop.xlane.xlu1 %542 }
 0x3a3   : > { %v2189_v30 = vmul.f32 0.00390625, %v543_v29 }
 0x3a4   : > { %v546_v31 = vpop.xlane.xlu0 %545 }
 0x3a5   : > { %v2191_v32 = vmul.f32 0.00390625, %v546_v31  ;;  %v602_v33 = vsub.f32 %v2143_v52, %v2189_v30  ;;  %v603_v34 = vsub.f32 %v2145_v61, %v2189_v30  ;;  %v569_v40 = vmul.f32 %v2189_v30, %v2189_v30 }
 0x3a7   : > { %v604_v36 = vsub.f32 %v2149_v2, %v2191_v32  ;;  %v605_v39 = vsub.f32 %v2155_v5, %v2191_v32  ;;  %v570_v45 = vmul.f32 %v2191_v32, %v2191_v32  ;;  %v573_v48 = vmul.f32 256.0, %v569_v40 }
 0x3a9   : > { %v574_v37 = vmul.f32 256.0, %v570_v45 }
 0x3aa   : > { %v549_v41 = vpop.xlane.xlu0 %548 }
 0x3ab   : > { %v2203_v44 = vmul.f32 0.00390625, %v549_v41 }
 0x3ac   : > { %v552_v46 = vpop.xlane.xlu1 %551 }
 0x3ad   : > { %v2207_v49 = vmul.f32 0.00390625, %v552_v46  ;;  %v571_v50 = vmul.f32 %v2203_v44, %v2203_v44  ;;  %v606_v53 = vsub.f32 %v2163_v13, %v2203_v44  ;;  %v607_v7 = vsub.f32 %v2165_v14, %v2203_v44  ;;  %v1806_v14 = vld [vmem:[%s2813_s2 + $0x10] sm:$0xff]   ;;  %v1807_v44 = vld [vmem:[%s2813_s2 + $0x18] sm:$0xff]  }
 0x3ae   : > { %v555_v8 = vpop.xlane.xlu0 %554 }
 0x3af   : > { %v577_v35 = vsub.f32 %v555_v8, %v573_v48  ;;  %v572_v38 = vmul.f32 %v2207_v49, %v2207_v49  ;;  %v608_v42 = vsub.f32 %v2169_v16, %v2207_v49  ;;  %v609_v54 = vsub.f32 %v2175_v21, %v2207_v49 }
 0x3b0   : > { %v558_v43 = vpop.xlane.xlu1 %557  ;;  %v575_v57 = vmul.f32 256.0, %v571_v50 }
 0x3b1   : > { %v581_v55 = vmul.f32 0.003921569, %v577_v35  ;;  %v578_v56 = vsub.f32 %v558_v43, %v574_v37  ;;  %v576_v51 = vmul.f32 256.0, %v572_v38 }
 0x3b2   : > { %v561_v58 = vpop.xlane.xlu0 %560 }
 0x3b3   : > { %v585_v59 = vadd.f32 0.001, %v581_v55  ;;  %v582_v60 = vmul.f32 0.003921569, %v578_v56  ;;  %v579_v19 = vsub.f32 %v561_v58, %v575_v57 }
 0x3b4   : > { %v564_v62 = vpop.xlane.xlu1 %563 }
 0x3b5   : > { %1822 = vrsqrt.f32 %v585_v59  ;;  %v586_v1 = vadd.f32 0.001, %v582_v60  ;;  %v583_v20 = vmul.f32 0.003921569, %v579_v19  ;;  %v580_v47 = vsub.f32 %v564_v62, %v576_v51 }
 0x3b7   : > { %1824 = vrsqrt.f32 %v586_v1  ;;  %v587_v63 = vadd.f32 0.001, %v583_v20  ;;  %v584_v3 = vmul.f32 0.003921569, %v580_v47 }
 0x3b8   : > { %v646_v27 = vpop.permute.xlu1 %645 }
 0x3b9   : > { %1826 = vrsqrt.f32 %v587_v63  ;;  %v588_v4 = vadd.f32 0.001, %v584_v3 }
 0x3ba   : > { %v651_v26 = vpop.permute.xlu0 %650 }
 0x3bb   : > { %1828 = vrsqrt.f32 %v588_v4 }
 0x3bf   : > { %v1823_v9 = vpop.eup %1822 }
 0x3c0   : > { %v598_v11 = vmul.f32 %v1823_v9, %v1677_v6 }
 0x3c1   : > { %v1825_v12 = vpop.eup %1824 }
 0x3c2   : > { %612 = vperm.xlu0 %1798, %v598_v11   ;;  %v599_v15 = vmul.f32 %v1825_v12, %v1678_v10 }
 0x3c3   : > { %v1827_v16 = vpop.eup %1826 }
 0x3c4   : > { %617 = vperm.xlu1 %1799, %v599_v15   ;;  %v600_v22 = vmul.f32 %v1827_v16, %v1679_v17 }
 0x3c5   : > { %v1829_v21 = vpop.eup %1828 }
 0x3c6   : > { %v601_v23 = vmul.f32 %v1829_v21, %v1680_v18 }
 0x3c8   : > { %622 = vperm.xlu1 %1799, %v600_v22   ;;  %627 = vperm.xlu0 %1798, %v601_v23  }
 0x3cc   : > { %655 = vperm.xlu1 %1799, %v1683_v24   ;;  %660 = vperm.xlu0 %1798, %v1684_v25   ;;  %v1697_v25 = vld [vmem:[%s2815_s4 + $0x40] sm:$0xff] }
 0x441   : > { %v613_v28 = vpop.permute.xlu0 %612 }
 0x442   : > { %v630_v29 = vmul.f32 %v613_v28, %v602_v33  ;;  %v631_v31 = vmul.f32 %v613_v28, %v603_v34 }
 0x443   : > { %v618_v40 = vpop.permute.xlu1 %617 }
 0x444   : > { %v663_v41 = vadd.f32 %v646_v27, %v630_v29  ;;  %v664_v45 = vadd.f32 %v646_v27, %v631_v31  ;;  %v632_v46 = vmul.f32 %v618_v40, %v604_v36  ;;  %v633_v48 = vmul.f32 %v618_v40, %v605_v39 }
 0x446   : > { %v665_v49 = vadd.f32 %v651_v26, %v632_v46  ;;  %v666_v50 = vadd.f32 %v651_v26, %v633_v48  ;;  %v671_v33 = vmax.f32 %v663_v41, 0.0  ;;  %v672_v35 = vmax.f32 %v664_v45, 0.0  ;;  %v1698_v26 = vld [vmem:[%s2815_s4 + $0x48] sm:$0xff] }
 0x447   : > { %v628_v8 = vpop.permute.xlu0 %627  ;;  %v623_v52 = vpop.permute.xlu1 %622 }
 0x448   : > { %v673_v37 = vmax.f32 %v665_v49, 0.0  ;;  %v674_v61 = vmax.f32 %v666_v50, 0.0  ;;  %v636_v30 = vmul.f32 %v628_v8, %v608_v42  ;;  %v637_v34 = vmul.f32 %v628_v8, %v609_v54 }
 0x449   : > { %v634_v2 = vmul.f32 %v623_v52, %v606_v53  ;;  %v635_v5 = vmul.f32 %v623_v52, %v607_v7 }
 0x44a   : > { %v684_v38 = vpack.c.bf16 %v673_v37, %v671_v33  ;;  %v685_v32 = vpack.c.bf16 %v674_v61, %v672_v35 }
 0x44b   : > { %v661_v36 = vpop.permute.xlu0 %660  ;;  %v656_v39 = vpop.permute.xlu1 %655 }
 0x44c   : > { %v669_v43 = vadd.f32 %v661_v36, %v636_v30  ;;  %v670_v55 = vadd.f32 %v661_v36, %v637_v34  ;;  %v667_v56 = vadd.f32 %v656_v39, %v634_v2  ;;  %v668_v57 = vadd.f32 %v656_v39, %v635_v5  ;;  %704 = vmatprep.subr.bf16.mxu0 %v685_v32 }
 0x44d   : > { %705 = vmatpush1.bf16.msra.mxu0 %v684_v38 }
 0x44e   : > { %v677_v42 = vmax.f32 %v669_v43, 0.0  ;;  %v678_v54 = vmax.f32 %v670_v55, 0.0  ;;  %v675_v58 = vmax.f32 %v667_v56, 0.0  ;;  %v676_v59 = vmax.f32 %v668_v57, 0.0 }
 0x450   : > { %v686_v60 = vpack.c.bf16 %v677_v42, %v675_v58  ;;  %v687_v13 = vpack.c.bf16 %v678_v54, %v676_v59 }
 0x452   : > { %706 = vmatprep.subr.bf16.mxu0 %v687_v13 }
 0x453   : > { %707 = vmatpush1.bf16.msra.mxu0 %v686_v60 }
 0x456   : > { %1691 = vmatmul.mubr.msk.bf16.vlgmr.msra.gmra.mrb[8].mxu0 %vm473_vm2, %v1806_v14 }
 0x457   : > { %746 = vmatprep.mubr.bf16.mxu0 %v1926_v0 }
 0x45e   : > { %1692 = vmatmul.mubr.msk.bf16.gmra.mrb[12].mxu0 %vm473_vm2, %v1807_v44 }
 0x45f   : > { %1184 = vmatprep.mubr.bf16.mxu0 %v1926_v0 }
 0x529   : > { %v2267_v53 = vpop.f32.mrb[8].mxu0 }
 0x52a   : > { %v2269_v7 = vpop.f32.mrb[9].mxu0  ;;  %v757_v19 = vmul.f32 %v2267_v53, %v2267_v53 }
 0x52b   : > { %v2273_v51 = vpop.f32.mrb[10].mxu0  ;;  %v765_v62 = vadd.f32 %v2269_v7, %v2267_v53  ;;  %v758_v1 = vmul.f32 %v2269_v7, %v2269_v7 }
 0x52c   : > { %v2279_v20 = vpop.f32.mrb[11].mxu0  ;;  %v759_v47 = vmul.f32 %v2273_v51, %v2273_v51 }
 0x52d   : > { %766 = vadd.xlane.f32.xlu1 %v765_v62  ;;  %v768_v63 = vadd.f32 %v2279_v20, %v2273_v51  ;;  %v777_v3 = vadd.f32 %v758_v1, %v757_v19  ;;  %v760_v4 = vmul.f32 %v2279_v20, %v2279_v20 }
 0x52f   : > { %769 = vadd.xlane.f32.xlu0 %v768_v63  ;;  %v780_v6 = vadd.f32 %v760_v4, %v759_v47  ;;  %v1693_v47 = vld [vmem:[%s2814_s3 + $0x40] sm:$0xff] }
 0x531   : > { %v2287_v9 = vpop.f32.mrb[12].mxu0 }
 0x532   : > { %v2289_v10 = vpop.f32.mrb[13].mxu0  ;;  %v761_v11 = vmul.f32 %v2287_v9, %v2287_v9 }
 0x533   : > { %v2293_v12 = vpop.f32.mrb[14].mxu0  ;;  %v771_v15 = vadd.f32 %v2289_v10, %v2287_v9  ;;  %v762_v16 = vmul.f32 %v2289_v10, %v2289_v10 }
 0x534   : > { %v2299_v17 = vpop.f32.mrb[15].mxu0  ;;  %v763_v18 = vmul.f32 %v2293_v12, %v2293_v12 }
 0x535   : > { %772 = vadd.xlane.f32.xlu0 %v771_v15  ;;  %v774_v21 = vadd.f32 %v2299_v17, %v2293_v12  ;;  %v783_v22 = vadd.f32 %v762_v16, %v761_v11  ;;  %v764_v23 = vmul.f32 %v2299_v17, %v2299_v17  ;;  %v1695_v15 = vld [vmem:[%s2814_s3 + $0x50] sm:$0xff]  ;;  %v1696_v16 = vld [vmem:[%s2814_s3 + $0x58] sm:$0xff] }
 0x537   : > { %775 = vadd.xlane.f32.xlu1 %v774_v21  ;;  %v786_v24 = vadd.f32 %v764_v23, %v763_v18  ;;  %v1700_v23 = vld [vmem:[%s2815_s4 + $0x58] sm:$0xff] }
 0x539   : > { %778 = vadd.xlane.f32.xlu0 %v777_v3  ;;  %v1694_v3 = vld [vmem:[%s2814_s3 + $0x48] sm:$0xff] }
 0x53b   : > { %781 = vadd.xlane.f32.xlu1 %v780_v6 }
 0x53d   : > { %784 = vadd.xlane.f32.xlu0 %v783_v22  ;;  %v1699_v22 = vld [vmem:[%s2815_s4 + $0x50] sm:$0xff] }
 0x53f   : > { %787 = vadd.xlane.f32.xlu1 %v786_v24 }
 0x550   : > { %869 = vperm.xlu1 %1799, %v1697_v25  }
 0x553   : > { %874 = vperm.xlu0 %1798, %v1698_v26  }
 0x5ba   : > { %v767_v27 = vpop.xlane.xlu1 %766 }
 0x5bb   : > { %v2313_v28 = vmul.f32 0.00390625, %v767_v27 }
 0x5bc   : > { %v770_v29 = vpop.xlane.xlu0 %769 }
 0x5bd   : > { %v2315_v31 = vmul.f32 0.00390625, %v770_v29  ;;  %v826_v40 = vsub.f32 %v2267_v53, %v2313_v28  ;;  %v827_v41 = vsub.f32 %v2269_v7, %v2313_v28  ;;  %v793_v48 = vmul.f32 %v2313_v28, %v2313_v28 }
 0x5bf   : > { %v828_v45 = vsub.f32 %v2273_v51, %v2315_v31  ;;  %v829_v46 = vsub.f32 %v2279_v20, %v2315_v31  ;;  %v794_v8 = vmul.f32 %v2315_v31, %v2315_v31  ;;  %v797_v33 = vmul.f32 256.0, %v793_v48 }
 0x5c1   : > { %v798_v2 = vmul.f32 256.0, %v794_v8 }
 0x5c2   : > { %v773_v49 = vpop.xlane.xlu0 %772 }
 0x5c3   : > { %v2327_v50 = vmul.f32 0.00390625, %v773_v49 }
 0x5c4   : > { %v776_v52 = vpop.xlane.xlu1 %775 }
 0x5c5   : > { %v2331_v35 = vmul.f32 0.00390625, %v776_v52  ;;  %v795_v37 = vmul.f32 %v2327_v50, %v2327_v50  ;;  %v830_v61 = vsub.f32 %v2287_v9, %v2327_v50  ;;  %v831_v30 = vsub.f32 %v2289_v10, %v2327_v50  ;;  %v1808_v10 = vld [vmem:[%s2813_s2 + $0x20] sm:$0xff]   ;;  %v1809_v50 = vld [vmem:[%s2813_s2 + $0x28] sm:$0xff]  }
 0x5c6   : > { %v779_v34 = vpop.xlane.xlu0 %778 }
 0x5c7   : > { %v801_v38 = vsub.f32 %v779_v34, %v797_v33  ;;  %v796_v5 = vmul.f32 %v2331_v35, %v2331_v35  ;;  %v832_v32 = vsub.f32 %v2293_v12, %v2331_v35  ;;  %v833_v39 = vsub.f32 %v2299_v17, %v2331_v35 }
 0x5c8   : > { %v782_v36 = vpop.xlane.xlu1 %781  ;;  %v799_v56 = vmul.f32 256.0, %v795_v37 }
 0x5c9   : > { %v805_v43 = vmul.f32 0.003921569, %v801_v38  ;;  %v802_v55 = vsub.f32 %v782_v36, %v798_v2  ;;  %v800_v59 = vmul.f32 256.0, %v796_v5 }
 0x5ca   : > { %v785_v57 = vpop.xlane.xlu0 %784 }
 0x5cb   : > { %v809_v42 = vadd.f32 0.001, %v805_v43  ;;  %v806_v54 = vmul.f32 0.003921569, %v802_v55  ;;  %v803_v58 = vsub.f32 %v785_v57, %v799_v56 }
 0x5cc   : > { %v788_v60 = vpop.xlane.xlu1 %787 }
 0x5cd   : > { %1830 = vrsqrt.f32 %v809_v42  ;;  %v810_v13 = vadd.f32 0.001, %v806_v54  ;;  %v807_v14 = vmul.f32 0.003921569, %v803_v58  ;;  %v804_v44 = vsub.f32 %v788_v60, %v800_v59 }
 0x5cf   : > { %1832 = vrsqrt.f32 %v810_v13  ;;  %v811_v19 = vadd.f32 0.001, %v807_v14  ;;  %v808_v62 = vmul.f32 0.003921569, %v804_v44 }
 0x5d0   : > { %v870_v25 = vpop.permute.xlu1 %869 }
 0x5d1   : > { %1834 = vrsqrt.f32 %v811_v19  ;;  %v812_v1 = vadd.f32 0.001, %v808_v62 }
 0x5d2   : > { %v875_v24 = vpop.permute.xlu0 %874 }
 0x5d3   : > { %1836 = vrsqrt.f32 %v812_v1 }
 0x5d7   : > { %v1831_v63 = vpop.eup %1830 }
 0x5d8   : > { %v822_v4 = vmul.f32 %v1831_v63, %v1693_v47 }
 0x5d9   : > { %v1833_v6 = vpop.eup %1832 }
 0x5da   : > { %836 = vperm.xlu0 %1798, %v822_v4   ;;  %v823_v11 = vmul.f32 %v1833_v6, %v1694_v3 }
 0x5db   : > { %v1835_v12 = vpop.eup %1834 }
 0x5dc   : > { %841 = vperm.xlu1 %1799, %v823_v11   ;;  %v824_v18 = vmul.f32 %v1835_v12, %v1695_v15 }
 0x5dd   : > { %v1837_v17 = vpop.eup %1836 }
 0x5de   : > { %v825_v21 = vmul.f32 %v1837_v17, %v1696_v16 }
 0x5e0   : > { %846 = vperm.xlu1 %1799, %v824_v18   ;;  %851 = vperm.xlu0 %1798, %v825_v21  }
 0x5e4   : > { %879 = vperm.xlu1 %1799, %v1699_v22   ;;  %884 = vperm.xlu0 %1798, %v1700_v23   ;;  %v1713_v23 = vld [vmem:[%s2815_s4 + $0x60] sm:$0xff] }
 0x659   : > { %v837_v26 = vpop.permute.xlu0 %836 }
 0x65a   : > { %v854_v27 = vmul.f32 %v837_v26, %v826_v40  ;;  %v855_v29 = vmul.f32 %v837_v26, %v827_v41 }
 0x65b   : > { %v842_v48 = vpop.permute.xlu1 %841 }
 0x65c   : > { %v887_v49 = vadd.f32 %v870_v25, %v854_v27  ;;  %v888_v8 = vadd.f32 %v870_v25, %v855_v29  ;;  %v856_v52 = vmul.f32 %v842_v48, %v828_v45  ;;  %v857_v33 = vmul.f32 %v842_v48, %v829_v46 }
 0x65e   : > { %v889_v35 = vadd.f32 %v875_v24, %v856_v52  ;;  %v890_v37 = vadd.f32 %v875_v24, %v857_v33  ;;  %v895_v40 = vmax.f32 %v887_v49, 0.0  ;;  %v896_v38 = vmax.f32 %v888_v8, 0.0  ;;  %v1714_v24 = vld [vmem:[%s2815_s4 + $0x68] sm:$0xff] }
 0x65f   : > { %v852_v34 = vpop.permute.xlu0 %851  ;;  %v847_v53 = vpop.permute.xlu1 %846 }
 0x660   : > { %v897_v2 = vmax.f32 %v889_v35, 0.0  ;;  %v898_v7 = vmax.f32 %v890_v37, 0.0  ;;  %v860_v28 = vmul.f32 %v852_v34, %v832_v32  ;;  %v861_v41 = vmul.f32 %v852_v34, %v833_v39 }
 0x661   : > { %v858_v51 = vmul.f32 %v847_v53, %v830_v61  ;;  %v859_v20 = vmul.f32 %v847_v53, %v831_v30 }
 0x662   : > { %v908_v5 = vpack.c.bf16 %v897_v2, %v895_v40  ;;  %v909_v31 = vpack.c.bf16 %v898_v7, %v896_v38 }
 0x663   : > { %v885_v45 = vpop.permute.xlu0 %884  ;;  %v880_v46 = vpop.permute.xlu1 %879 }
 0x664   : > { %v893_v36 = vadd.f32 %v885_v45, %v860_v28  ;;  %v894_v43 = vadd.f32 %v885_v45, %v861_v41  ;;  %v891_v55 = vadd.f32 %v880_v46, %v858_v51  ;;  %v892_v56 = vadd.f32 %v880_v46, %v859_v20  ;;  %928 = vmatprep.subr.bf16.mxu1 %v909_v31 }
 0x665   : > { %929 = vmatpush1.bf16.msra.mxu1 %v908_v5 }
 0x666   : > { %v901_v32 = vmax.f32 %v893_v36, 0.0  ;;  %v902_v39 = vmax.f32 %v894_v43, 0.0  ;;  %v899_v57 = vmax.f32 %v891_v55, 0.0  ;;  %v900_v42 = vmax.f32 %v892_v56, 0.0 }
 0x668   : > { %v910_v54 = vpack.c.bf16 %v901_v32, %v899_v57  ;;  %v911_v9 = vpack.c.bf16 %v902_v39, %v900_v42 }
 0x66a   : > { %930 = vmatprep.subr.bf16.mxu1 %v911_v9 }
 0x66b   : > { %931 = vmatpush1.bf16.msra.mxu1 %v910_v54 }
 0x66e   : > { %1707 = vmatmul.mubr.msk.bf16.vlgmr.msra.gmra.mrb[8].mxu1 %vm473_vm2, %v1808_v10 }
 0x66f   : > { %970 = vmatprep.mubr.bf16.mxu1 %v1926_v0 }
 0x676   : > { %1708 = vmatmul.mubr.msk.bf16.gmra.mrb[12].mxu1 %vm473_vm2, %v1809_v50 }
 0x677   : > { %1408 = vmatprep.mubr.bf16.mxu1 %v1926_v0 }
 0x741   : > { %v2391_v61 = vpop.f32.mrb[8].mxu1 }
 0x742   : > { %v2393_v30 = vpop.f32.mrb[9].mxu1  ;;  %v981_v58 = vmul.f32 %v2391_v61, %v2391_v61 }
 0x743   : > { %v2397_v59 = vpop.f32.mrb[10].mxu1  ;;  %v989_v60 = vadd.f32 %v2393_v30, %v2391_v61  ;;  %v982_v13 = vmul.f32 %v2393_v30, %v2393_v30 }
 0x744   : > { %v2403_v14 = vpop.f32.mrb[11].mxu1  ;;  %v983_v44 = vmul.f32 %v2397_v59, %v2397_v59 }
 0x745   : > { %990 = vadd.xlane.f32.xlu1 %v989_v60  ;;  %v992_v19 = vadd.f32 %v2403_v14, %v2397_v59  ;;  %v1001_v62 = vadd.f32 %v982_v13, %v981_v58  ;;  %v984_v1 = vmul.f32 %v2403_v14, %v2403_v14 }
 0x747   : > { %993 = vadd.xlane.f32.xlu0 %v992_v19  ;;  %v1004_v47 = vadd.f32 %v984_v1, %v983_v44  ;;  %v1709_v44 = vld [vmem:[%s2814_s3 + $0x60] sm:$0xff] }
 0x749   : > { %v2411_v63 = vpop.f32.mrb[12].mxu1 }
 0x74a   : > { %v2413_v3 = vpop.f32.mrb[13].mxu1  ;;  %v985_v4 = vmul.f32 %v2411_v63, %v2411_v63 }
 0x74b   : > { %v2417_v6 = vpop.f32.mrb[14].mxu1  ;;  %v995_v11 = vadd.f32 %v2413_v3, %v2411_v63  ;;  %v986_v12 = vmul.f32 %v2413_v3, %v2413_v3 }
 0x74c   : > { %v2423_v15 = vpop.f32.mrb[15].mxu1  ;;  %v987_v16 = vmul.f32 %v2417_v6, %v2417_v6 }
 0x74d   : > { %996 = vadd.xlane.f32.xlu0 %v995_v11  ;;  %v998_v17 = vadd.f32 %v2423_v15, %v2417_v6  ;;  %v1007_v18 = vadd.f32 %v986_v12, %v985_v4  ;;  %v988_v21 = vmul.f32 %v2423_v15, %v2423_v15  ;;  %v1711_v11 = vld [vmem:[%s2814_s3 + $0x70] sm:$0xff]  ;;  %v1712_v12 = vld [vmem:[%s2814_s3 + $0x78] sm:$0xff] }
 0x74f   : > { %999 = vadd.xlane.f32.xlu1 %v998_v17  ;;  %v1010_v22 = vadd.f32 %v988_v21, %v987_v16  ;;  %v1716_v21 = vld [vmem:[%s2815_s4 + $0x78] sm:$0xff] }
 0x751   : > { %1002 = vadd.xlane.f32.xlu0 %v1001_v62  ;;  %v1710_v62 = vld [vmem:[%s2814_s3 + $0x68] sm:$0xff] }
 0x753   : > { %1005 = vadd.xlane.f32.xlu1 %v1004_v47 }
 0x755   : > { %1008 = vadd.xlane.f32.xlu0 %v1007_v18  ;;  %v1715_v18 = vld [vmem:[%s2815_s4 + $0x70] sm:$0xff] }
 0x757   : > { %1011 = vadd.xlane.f32.xlu1 %v1010_v22 }
 0x768   : > { %1093 = vperm.xlu1 %1799, %v1713_v23  }
 0x76b   : > { %1098 = vperm.xlu0 %1798, %v1714_v24  }
 0x7d2   : > { %v991_v25 = vpop.xlane.xlu1 %990 }
 0x7d3   : > { %v2437_v26 = vmul.f32 0.00390625, %v991_v25 }
 0x7d4   : > { %v994_v27 = vpop.xlane.xlu0 %993 }
 0x7d5   : > { %v2439_v29 = vmul.f32 0.00390625, %v994_v27  ;;  %v1050_v48 = vsub.f32 %v2391_v61, %v2437_v26  ;;  %v1051_v49 = vsub.f32 %v2393_v30, %v2437_v26  ;;  %v1017_v33 = vmul.f32 %v2437_v26, %v2437_v26 }
 0x7d7   : > { %v1052_v8 = vsub.f32 %v2397_v59, %v2439_v29  ;;  %v1053_v52 = vsub.f32 %v2403_v14, %v2439_v29  ;;  %v1018_v34 = vmul.f32 %v2439_v29, %v2439_v29  ;;  %v1021_v40 = vmul.f32 256.0, %v1017_v33 }
 0x7d9   : > { %v1022_v51 = vmul.f32 256.0, %v1018_v34 }
 0x7da   : > { %v997_v35 = vpop.xlane.xlu0 %996 }
 0x7db   : > { %v2451_v37 = vmul.f32 0.00390625, %v997_v35 }
 0x7dc   : > { %v1000_v53 = vpop.xlane.xlu1 %999 }
 0x7dd   : > { %v2455_v38 = vmul.f32 0.00390625, %v1000_v53  ;;  %v1019_v2 = vmul.f32 %v2451_v37, %v2451_v37  ;;  %v1054_v7 = vsub.f32 %v2411_v63, %v2451_v37  ;;  %v1055_v28 = vsub.f32 %v2413_v3, %v2451_v37  ;;  %v1810_v3 = vld [vmem:[%s2813_s2 + $0x30] sm:$0xff]   ;;  %v1811_v37 = vld [vmem:[%s2813_s2 + $0x38] sm:$0xff]  }
 0x7de   : > { %v1003_v41 = vpop.xlane.xlu0 %1002 }
 0x7df   : > { %v1025_v5 = vsub.f32 %v1003_v41, %v1021_v40  ;;  %v1020_v20 = vmul.f32 %v2455_v38, %v2455_v38  ;;  %v1056_v31 = vsub.f32 %v2417_v6, %v2455_v38  ;;  %v1057_v46 = vsub.f32 %v2423_v15, %v2455_v38 }
 0x7e0   : > { %v1006_v45 = vpop.xlane.xlu1 %1005  ;;  %v1023_v55 = vmul.f32 256.0, %v1019_v2 }
 0x7e1   : > { %v1029_v36 = vmul.f32 0.003921569, %v1025_v5  ;;  %v1026_v43 = vsub.f32 %v1006_v45, %v1022_v51  ;;  %v1024_v42 = vmul.f32 256.0, %v1020_v20 }
 0x7e2   : > { %v1009_v56 = vpop.xlane.xlu0 %1008 }
 0x7e3   : > { %v1033_v32 = vadd.f32 0.001, %v1029_v36  ;;  %v1030_v39 = vmul.f32 0.003921569, %v1026_v43  ;;  %v1027_v57 = vsub.f32 %v1009_v56, %v1023_v55 }
 0x7e4   : > { %v1012_v54 = vpop.xlane.xlu1 %1011 }
 0x7e5   : > { %1838 = vrsqrt.f32 %v1033_v32  ;;  %v1034_v9 = vadd.f32 0.001, %v1030_v39  ;;  %v1031_v10 = vmul.f32 0.003921569, %v1027_v57  ;;  %v1028_v50 = vsub.f32 %v1012_v54, %v1024_v42 }
 0x7e7   : > { %1840 = vrsqrt.f32 %v1034_v9  ;;  %v1035_v58 = vadd.f32 0.001, %v1031_v10  ;;  %v1032_v60 = vmul.f32 0.003921569, %v1028_v50 }
 0x7e8   : > { %v1094_v23 = vpop.permute.xlu1 %1093 }
 0x7e9   : > { %1842 = vrsqrt.f32 %v1035_v58  ;;  %v1036_v13 = vadd.f32 0.001, %v1032_v60 }
 0x7ea   : > { %v1099_v22 = vpop.permute.xlu0 %1098 }
 0x7eb   : > { %1844 = vrsqrt.f32 %v1036_v13 }
 0x7ef   : > { %v1839_v19 = vpop.eup %1838 }
 0x7f0   : > { %v1046_v1 = vmul.f32 %v1839_v19, %v1709_v44 }
 0x7f1   : > { %v1841_v47 = vpop.eup %1840 }
 0x7f2   : > { %1060 = vperm.xlu0 %1798, %v1046_v1   ;;  %v1047_v4 = vmul.f32 %v1841_v47, %v1710_v62 }
 0x7f3   : > { %v1843_v6 = vpop.eup %1842 }
 0x7f4   : > { %1065 = vperm.xlu1 %1799, %v1047_v4   ;;  %v1048_v16 = vmul.f32 %v1843_v6, %v1711_v11 }
 0x7f5   : > { %v1845_v15 = vpop.eup %1844 }
 0x7f6   : > { %v1049_v17 = vmul.f32 %v1845_v15, %v1712_v12 }
 0x7f8   : > { %1070 = vperm.xlu1 %1799, %v1048_v16   ;;  %1075 = vperm.xlu0 %1798, %v1049_v17  }
 0x7fc   : > { %1103 = vperm.xlu1 %1799, %v1715_v18   ;;  %1108 = vperm.xlu0 %1798, %v1716_v21   ;;  %v1729_v21 = vld [vmem:[%s2815_s4 + $0x80] sm:$0xff] }
 0x871   : > { %v1061_v24 = vpop.permute.xlu0 %1060 }
 0x872   : > { %v1078_v25 = vmul.f32 %v1061_v24, %v1050_v48  ;;  %v1079_v27 = vmul.f32 %v1061_v24, %v1051_v49 }
 0x873   : > { %v1066_v33 = vpop.permute.xlu1 %1065 }
 0x874   : > { %v1111_v35 = vadd.f32 %v1094_v23, %v1078_v25  ;;  %v1112_v34 = vadd.f32 %v1094_v23, %v1079_v27  ;;  %v1080_v53 = vmul.f32 %v1066_v33, %v1052_v8  ;;  %v1081_v40 = vmul.f32 %v1066_v33, %v1053_v52 }
 0x876   : > { %v1113_v38 = vadd.f32 %v1099_v22, %v1080_v53  ;;  %v1114_v2 = vadd.f32 %v1099_v22, %v1081_v40  ;;  %v1119_v48 = vmax.f32 %v1111_v35, 0.0  ;;  %v1120_v5 = vmax.f32 %v1112_v34, 0.0  ;;  %v1730_v22 = vld [vmem:[%s2815_s4 + $0x88] sm:$0xff] }
 0x877   : > { %v1076_v41 = vpop.permute.xlu0 %1075  ;;  %v1071_v61 = vpop.permute.xlu1 %1070 }
 0x878   : > { %v1121_v51 = vmax.f32 %v1113_v38, 0.0  ;;  %v1122_v30 = vmax.f32 %v1114_v2, 0.0  ;;  %v1084_v26 = vmul.f32 %v1076_v41, %v1056_v31  ;;  %v1085_v49 = vmul.f32 %v1076_v41, %v1057_v46 }
 0x879   : > { %v1082_v59 = vmul.f32 %v1071_v61, %v1054_v7  ;;  %v1083_v14 = vmul.f32 %v1071_v61, %v1055_v28 }
 0x87a   : > { %v1132_v20 = vpack.c.bf16 %v1121_v51, %v1119_v48  ;;  %v1133_v29 = vpack.c.bf16 %v1122_v30, %v1120_v5 }
 0x87b   : > { %v1109_v8 = vpop.permute.xlu0 %1108  ;;  %v1104_v52 = vpop.permute.xlu1 %1103 }
 0x87c   : > { %v1117_v45 = vadd.f32 %v1109_v8, %v1084_v26  ;;  %v1118_v36 = vadd.f32 %v1109_v8, %v1085_v49  ;;  %v1115_v43 = vadd.f32 %v1104_v52, %v1082_v59  ;;  %v1116_v55 = vadd.f32 %v1104_v52, %v1083_v14  ;;  %1152 = vmatprep.subr.bf16.mxu0 %v1133_v29 }
 0x87d   : > { %1153 = vmatpush1.bf16.msra.mxu0 %v1132_v20 }
 0x87e   : > { %v1125_v31 = vmax.f32 %v1117_v45, 0.0  ;;  %v1126_v46 = vmax.f32 %v1118_v36, 0.0  ;;  %v1123_v56 = vmax.f32 %v1115_v43, 0.0  ;;  %v1124_v32 = vmax.f32 %v1116_v55, 0.0 }
 0x880   : > { %v1134_v39 = vpack.c.bf16 %v1125_v31, %v1123_v56  ;;  %v1135_v63 = vpack.c.bf16 %v1126_v46, %v1124_v32 }
 0x882   : > { %1154 = vmatprep.subr.bf16.mxu0 %v1135_v63 }
 0x883   : > { %1155 = vmatpush1.bf16.msra.mxu0 %v1134_v39 }
 0x886   : > { %1723 = vmatmul.mubr.msk.bf16.vlgmr.msra.gmra.mrb[16].mxu0 %vm473_vm2, %v1810_v3 }
 0x887   : > { %1194 = vmatprep.mubr.bf16.mxu0 %v1926_v0 }
 0x88e   : > { %1724 = vmatmul.mubr.msk.bf16.gmra.mrb[20].mxu0 %vm473_vm2, %v1811_v37 }
 0x959   : > { %v2514_v7 = vpop.f32.mrb[16].mxu0 }
 0x95a   : > { %v2516_v28 = vpop.f32.mrb[17].mxu0  ;;  %v1205_v57 = vmul.f32 %v2514_v7, %v2514_v7 }
 0x95b   : > { %v2520_v42 = vpop.f32.mrb[18].mxu0  ;;  %v1213_v54 = vadd.f32 %v2516_v28, %v2514_v7  ;;  %v1206_v9 = vmul.f32 %v2516_v28, %v2516_v28 }
 0x95c   : > { %v2526_v10 = vpop.f32.mrb[19].mxu0  ;;  %v1207_v50 = vmul.f32 %v2520_v42, %v2520_v42 }
 0x95d   : > { %1214 = vadd.xlane.f32.xlu1 %v1213_v54  ;;  %v1216_v58 = vadd.f32 %v2526_v10, %v2520_v42  ;;  %v1225_v60 = vadd.f32 %v1206_v9, %v1205_v57  ;;  %v1208_v13 = vmul.f32 %v2526_v10, %v2526_v10 }
 0x95f   : > { %1217 = vadd.xlane.f32.xlu0 %v1216_v58  ;;  %v1228_v44 = vadd.f32 %v1208_v13, %v1207_v50  ;;  %v1725_v50 = vld [vmem:[%s2814_s3 + $0x80] sm:$0xff] }
 0x961   : > { %v2534_v19 = vpop.f32.mrb[20].mxu0 }
 0x962   : > { %v2536_v62 = vpop.f32.mrb[21].mxu0  ;;  %v1209_v1 = vmul.f32 %v2534_v19, %v2534_v19 }
 0x963   : > { %v2540_v47 = vpop.f32.mrb[22].mxu0  ;;  %v1219_v4 = vadd.f32 %v2536_v62, %v2534_v19  ;;  %v1210_v6 = vmul.f32 %v2536_v62, %v2536_v62 }
 0x964   : > { %v2546_v11 = vpop.f32.mrb[23].mxu0  ;;  %v1211_v12 = vmul.f32 %v2540_v47, %v2540_v47 }
 0x965   : > { %v1212_v15 = vmul.f32 %v2546_v11, %v2546_v11  ;;  %1220 = vadd.xlane.f32.xlu0 %v1219_v4  ;;  %v1222_v16 = vadd.f32 %v2546_v11, %v2540_v47  ;;  %v1231_v17 = vadd.f32 %v1210_v6, %v1209_v1  ;;  %v1727_v4 = vld [vmem:[%s2814_s3 + $0x90] sm:$0xff]  ;;  %v1728_v6 = vld [vmem:[%s2814_s3 + $0x98] sm:$0xff] }
 0x967   : > { %1223 = vadd.xlane.f32.xlu1 %v1222_v16  ;;  %v1234_v18 = vadd.f32 %v1212_v15, %v1211_v12  ;;  %v1731_v16 = vld [vmem:[%s2815_s4 + $0x90] sm:$0xff] }
 0x969   : > { %1226 = vadd.xlane.f32.xlu0 %v1225_v60  ;;  %v1726_v60 = vld [vmem:[%s2814_s3 + $0x88] sm:$0xff] }
 0x96b   : > { %1229 = vadd.xlane.f32.xlu1 %v1228_v44 }
 0x96d   : > { %1232 = vadd.xlane.f32.xlu0 %v1231_v17  ;;  %v1732_v17 = vld [vmem:[%s2815_s4 + $0x98] sm:$0xff] }
 0x96f   : > { %1235 = vadd.xlane.f32.xlu1 %v1234_v18 }
 0x980   : > { %1317 = vperm.xlu1 %1799, %v1729_v21  }
 0x983   : > { %1322 = vperm.xlu0 %1798, %v1730_v22  }
 0x9ea   : > { %v1215_v23 = vpop.xlane.xlu1 %1214 }
 0x9eb   : > { %v2560_v24 = vmul.f32 0.00390625, %v1215_v23 }
 0x9ec   : > { %v1218_v25 = vpop.xlane.xlu0 %1217 }
 0x9ed   : > { %v2562_v27 = vmul.f32 0.00390625, %v1218_v25  ;;  %v1274_v33 = vsub.f32 %v2514_v7, %v2560_v24  ;;  %v1275_v35 = vsub.f32 %v2516_v28, %v2560_v24  ;;  %v1241_v40 = vmul.f32 %v2560_v24, %v2560_v24 }
 0x9ef   : > { %v1276_v34 = vsub.f32 %v2520_v42, %v2562_v27  ;;  %v1277_v53 = vsub.f32 %v2526_v10, %v2562_v27  ;;  %v1242_v41 = vmul.f32 %v2562_v27, %v2562_v27  ;;  %v1245_v48 = vmul.f32 256.0, %v1241_v40 }
 0x9f1   : > { %v1246_v59 = vmul.f32 256.0, %v1242_v41 }
 0x9f2   : > { %v1221_v38 = vpop.xlane.xlu0 %1220 }
 0x9f3   : > { %v2574_v2 = vmul.f32 0.00390625, %v1221_v38 }
 0x9f4   : > { %v1224_v61 = vpop.xlane.xlu1 %1223 }
 0x9f5   : > { %v2578_v5 = vmul.f32 0.00390625, %v1224_v61  ;;  %v1243_v51 = vmul.f32 %v2574_v2, %v2574_v2  ;;  %v1278_v30 = vsub.f32 %v2534_v19, %v2574_v2  ;;  %v1279_v26 = vsub.f32 %v2536_v62, %v2574_v2  ;;  %v1812_v62 = vld [vmem:[%s2813_s2 + $0x40] sm:$0xff]   ;;  %v1813_v2 = vld [vmem:[%s2813_s2 + $0x48] sm:$0xff]  }
 0x9f6   : > { %v1227_v49 = vpop.xlane.xlu0 %1226 }
 0x9f7   : > { %v1249_v20 = vsub.f32 %v1227_v49, %v1245_v48  ;;  %v1244_v14 = vmul.f32 %v2578_v5, %v2578_v5  ;;  %v1280_v29 = vsub.f32 %v2540_v47, %v2578_v5  ;;  %v1281_v52 = vsub.f32 %v2546_v11, %v2578_v5 }
 0x9f8   : > { %v1230_v8 = vpop.xlane.xlu1 %1229  ;;  %v1247_v43 = vmul.f32 256.0, %v1243_v51 }
 0x9f9   : > { %v1253_v45 = vmul.f32 0.003921569, %v1249_v20  ;;  %v1250_v36 = vsub.f32 %v1230_v8, %v1246_v59  ;;  %v1248_v32 = vmul.f32 256.0, %v1244_v14 }
 0x9fa   : > { %v1233_v55 = vpop.xlane.xlu0 %1232 }
 0x9fb   : > { %v1257_v31 = vadd.f32 0.001, %v1253_v45  ;;  %v1254_v46 = vmul.f32 0.003921569, %v1250_v36  ;;  %v1251_v56 = vsub.f32 %v1233_v55, %v1247_v43 }
 0x9fc   : > { %v1236_v39 = vpop.xlane.xlu1 %1235 }
 0x9fd   : > { %1846 = vrsqrt.f32 %v1257_v31  ;;  %v1258_v63 = vadd.f32 0.001, %v1254_v46  ;;  %v1255_v3 = vmul.f32 0.003921569, %v1251_v56  ;;  %v1252_v37 = vsub.f32 %v1236_v39, %v1248_v32 }
 0x9ff   : > { %1848 = vrsqrt.f32 %v1258_v63  ;;  %v1259_v57 = vadd.f32 0.001, %v1255_v3  ;;  %v1256_v54 = vmul.f32 0.003921569, %v1252_v37 }
 0xa00   : > { %v1318_v21 = vpop.permute.xlu1 %1317 }
 0xa01   : > { %1850 = vrsqrt.f32 %v1259_v57  ;;  %v1260_v9 = vadd.f32 0.001, %v1256_v54 }
 0xa02   : > { %v1323_v18 = vpop.permute.xlu0 %1322 }
 0xa03   : > { %1852 = vrsqrt.f32 %v1260_v9 }
 0xa07   : > { %v1847_v58 = vpop.eup %1846 }
 0xa08   : > { %v1270_v13 = vmul.f32 %v1847_v58, %v1725_v50 }
 0xa09   : > { %v1849_v44 = vpop.eup %1848 }
 0xa0a   : > { %1284 = vperm.xlu0 %1798, %v1270_v13   ;;  %v1271_v1 = vmul.f32 %v1849_v44, %v1726_v60 }
 0xa0b   : > { %v1851_v47 = vpop.eup %1850 }
 0xa0c   : > { %1289 = vperm.xlu1 %1799, %v1271_v1   ;;  %v1272_v12 = vmul.f32 %v1851_v47, %v1727_v4 }
 0xa0d   : > { %v1853_v11 = vpop.eup %1852 }
 0xa0e   : > { %v1273_v15 = vmul.f32 %v1853_v11, %v1728_v6 }
 0xa10   : > { %1294 = vperm.xlu1 %1799, %v1272_v12   ;;  %1299 = vperm.xlu0 %1798, %v1273_v15  }
 0xa14   : > { %1327 = vperm.xlu1 %1799, %v1731_v16   ;;  %1332 = vperm.xlu0 %1798, %v1732_v17   ;;  %v1745_v16 = vld [vmem:[%s2815_s4 + $0xa0] sm:$0xff]  ;;  %v1746_v17 = vld [vmem:[%s2815_s4 + $0xa8] sm:$0xff] }
 0xa89   : > { %v1285_v22 = vpop.permute.xlu0 %1284 }
 0xa8a   : > { %v1302_v23 = vmul.f32 %v1285_v22, %v1274_v33  ;;  %v1303_v25 = vmul.f32 %v1285_v22, %v1275_v35 }
 0xa8b   : > { %v1290_v40 = vpop.permute.xlu1 %1289 }
 0xa8c   : > { %v1335_v38 = vadd.f32 %v1318_v21, %v1302_v23  ;;  %v1336_v41 = vadd.f32 %v1318_v21, %v1303_v25  ;;  %v1304_v61 = vmul.f32 %v1290_v40, %v1276_v34  ;;  %v1305_v48 = vmul.f32 %v1290_v40, %v1277_v53 }
 0xa8e   : > { %v1337_v5 = vadd.f32 %v1323_v18, %v1304_v61  ;;  %v1338_v51 = vadd.f32 %v1323_v18, %v1305_v48  ;;  %v1343_v33 = vmax.f32 %v1335_v38, 0.0  ;;  %v1344_v20 = vmax.f32 %v1336_v41, 0.0 }
 0xa8f   : > { %v1300_v49 = vpop.permute.xlu0 %1299  ;;  %v1295_v7 = vpop.permute.xlu1 %1294 }
 0xa90   : > { %v1345_v59 = vmax.f32 %v1337_v5, 0.0  ;;  %v1346_v28 = vmax.f32 %v1338_v51, 0.0  ;;  %v1308_v24 = vmul.f32 %v1300_v49, %v1280_v29  ;;  %v1309_v35 = vmul.f32 %v1300_v49, %v1281_v52 }
 0xa91   : > { %v1306_v42 = vmul.f32 %v1295_v7, %v1278_v30  ;;  %v1307_v10 = vmul.f32 %v1295_v7, %v1279_v26 }
 0xa92   : > { %v1356_v14 = vpack.c.bf16 %v1345_v59, %v1343_v33  ;;  %v1357_v27 = vpack.c.bf16 %v1346_v28, %v1344_v20 }
 0xa93   : > { %v1333_v34 = vpop.permute.xlu0 %1332  ;;  %v1328_v53 = vpop.permute.xlu1 %1327 }
 0xa94   : > { %v1341_v8 = vadd.f32 %v1333_v34, %v1308_v24  ;;  %v1342_v45 = vadd.f32 %v1333_v34, %v1309_v35  ;;  %v1339_v36 = vadd.f32 %v1328_v53, %v1306_v42  ;;  %v1340_v43 = vadd.f32 %v1328_v53, %v1307_v10  ;;  %1376 = vmatprep.subr.bf16.mxu1 %v1357_v27 }
 0xa95   : > { %1377 = vmatpush1.bf16.msra.mxu1 %v1356_v14 }
 0xa96   : > { %v1349_v29 = vmax.f32 %v1341_v8, 0.0  ;;  %v1350_v52 = vmax.f32 %v1342_v45, 0.0  ;;  %v1347_v55 = vmax.f32 %v1339_v36, 0.0  ;;  %v1348_v31 = vmax.f32 %v1340_v43, 0.0 }
 0xa98   : > { %v1358_v46 = vpack.c.bf16 %v1349_v29, %v1347_v55  ;;  %v1359_v19 = vpack.c.bf16 %v1350_v52, %v1348_v31 }
 0xa9a   : > { %1378 = vmatprep.subr.bf16.mxu1 %v1359_v19 }
 0xa9b   : > { %1379 = vmatpush1.bf16.msra.mxu1 %v1358_v46 }
 0xa9e   : > { %1739 = vmatmul.mubr.msk.bf16.vlgmr.msra.gmra.mrb[16].mxu1 %vm473_vm2, %v1812_v62 }
 0xa9f   : > { %1418 = vmatprep.mubr.bf16.mxu1 %v1926_v0 }
 0xaa6   : > { %1740 = vmatmul.mubr.msk.bf16.gmra.mrb[20].mxu1 %vm473_vm2, %v1813_v2 }
 0xb71   : > { %v2637_v30 = vpop.f32.mrb[16].mxu1 }
 0xb72   : > { %v2639_v26 = vpop.f32.mrb[17].mxu1  ;;  %v1429_v56 = vmul.f32 %v2637_v30, %v2637_v30 }
 0xb73   : > { %v2643_v32 = vpop.f32.mrb[18].mxu1  ;;  %v1437_v39 = vadd.f32 %v2639_v26, %v2637_v30  ;;  %v1430_v0 = vmul.f32 %v2639_v26, %v2639_v26 }
 0xb74   : > { %v2649_v63 = vpop.f32.mrb[19].mxu1  ;;  %v1431_v3 = vmul.f32 %v2643_v32, %v2643_v32 }
 0xb75   : > { %1438 = vadd.xlane.f32.xlu1 %v1437_v39  ;;  %v1440_v37 = vadd.f32 %v2649_v63, %v2643_v32  ;;  %v1449_v57 = vadd.f32 %v1430_v0, %v1429_v56  ;;  %v1432_v54 = vmul.f32 %v2649_v63, %v2649_v63  ;;  %v1741_v0 = vld [vmem:[%s2814_s3 + $0xa0] sm:$0xff] }
 0xb77   : > { %1441 = vadd.xlane.f32.xlu0 %v1440_v37  ;;  %v1452_v9 = vadd.f32 %v1432_v54, %v1431_v3  ;;  %v1742_v37 = vld [vmem:[%s2814_s3 + $0xa8] sm:$0xff] }
 0xb79   : > { %v2657_v50 = vpop.f32.mrb[20].mxu1 }
 0xb7a   : > { %v2659_v58 = vpop.f32.mrb[21].mxu1  ;;  %v1433_v60 = vmul.f32 %v2657_v50, %v2657_v50 }
 0xb7b   : > { %v2663_v13 = vpop.f32.mrb[22].mxu1  ;;  %v1443_v44 = vadd.f32 %v2659_v58, %v2657_v50  ;;  %v1434_v1 = vmul.f32 %v2659_v58, %v2659_v58 }
 0xb7c   : > { %v2669_v47 = vpop.f32.mrb[23].mxu1  ;;  %v1435_v4 = vmul.f32 %v2663_v13, %v2663_v13 }
 0xb7d   : > { %v1436_v6 = vmul.f32 %v2669_v47, %v2669_v47  ;;  %1444 = vadd.xlane.f32.xlu0 %v1443_v44  ;;  %v1446_v11 = vadd.f32 %v2669_v47, %v2663_v13  ;;  %v1455_v12 = vadd.f32 %v1434_v1, %v1433_v60  ;;  %v1743_v44 = vld [vmem:[%s2814_s3 + $0xb0] sm:$0xff]  ;;  %v1744_v1 = vld [vmem:[%s2814_s3 + $0xb8] sm:$0xff] }
 0xb7f   : > { %1447 = vadd.xlane.f32.xlu1 %v1446_v11  ;;  %v1458_v15 = vadd.f32 %v1436_v6, %v1435_v4 }
 0xb81   : > { %1450 = vadd.xlane.f32.xlu0 %v1449_v57 }
 0xb83   : > { %1453 = vadd.xlane.f32.xlu1 %v1452_v9 }
 0xb85   : > { %1456 = vadd.xlane.f32.xlu0 %v1455_v12  ;;  %v1747_v12 = vld [vmem:[%s2815_s4 + $0xb0] sm:$0xff] }
 0xb87   : > { %1459 = vadd.xlane.f32.xlu1 %v1458_v15  ;;  %v1748_v15 = vld [vmem:[%s2815_s4 + $0xb8] sm:$0xff] }
 0xb98   : > { %1541 = vperm.xlu1 %1799, %v1745_v16  }
 0xb9b   : > { %1546 = vperm.xlu0 %1798, %v1746_v17  }
 0xc02   : > { %v1439_v18 = vpop.xlane.xlu1 %1438 }
 0xc03   : > { %v2683_v21 = vmul.f32 0.00390625, %v1439_v18 }
 0xc04   : > { %v1442_v22 = vpop.xlane.xlu0 %1441 }
 0xc05   : > { %v2685_v23 = vmul.f32 0.00390625, %v1442_v22  ;;  %v1498_v25 = vsub.f32 %v2637_v30, %v2683_v21  ;;  %v1499_v40 = vsub.f32 %v2639_v26, %v2683_v21  ;;  %v1465_v61 = vmul.f32 %v2683_v21, %v2683_v21 }
 0xc07   : > { %v1500_v38 = vsub.f32 %v2643_v32, %v2685_v23  ;;  %v1501_v41 = vsub.f32 %v2649_v63, %v2685_v23  ;;  %v1466_v51 = vmul.f32 %v2685_v23, %v2685_v23  ;;  %v1469_v7 = vmul.f32 256.0, %v1465_v61 }
 0xc09   : > { %v1470_v14 = vmul.f32 256.0, %v1466_v51 }
 0xc0a   : > { %v1445_v48 = vpop.xlane.xlu0 %1444 }
 0xc0b   : > { %v2697_v5 = vmul.f32 0.00390625, %v1445_v48 }
 0xc0c   : > { %v1448_v49 = vpop.xlane.xlu1 %1447 }
 0xc0d   : > { %v2701_v33 = vmul.f32 0.00390625, %v1448_v49  ;;  %v1467_v20 = vmul.f32 %v2697_v5, %v2697_v5  ;;  %v1502_v59 = vsub.f32 %v2657_v50, %v2697_v5  ;;  %v1503_v28 = vsub.f32 %v2659_v58, %v2697_v5 }
 0xc0e   : > { %v1451_v24 = vpop.xlane.xlu0 %1450 }
 0xc0f   : > { %v1473_v35 = vsub.f32 %v1451_v24, %v1469_v7  ;;  %v1468_v42 = vmul.f32 %v2701_v33, %v2701_v33  ;;  %v1504_v10 = vsub.f32 %v2663_v13, %v2701_v33  ;;  %v1505_v34 = vsub.f32 %v2669_v47, %v2701_v33 }
 0xc10   : > { %v1454_v27 = vpop.xlane.xlu1 %1453  ;;  %v1471_v45 = vmul.f32 256.0, %v1467_v20 }
 0xc11   : > { %v1477_v53 = vmul.f32 0.003921569, %v1473_v35  ;;  %v1474_v8 = vsub.f32 %v1454_v27, %v1470_v14  ;;  %v1472_v55 = vmul.f32 256.0, %v1468_v42 }
 0xc12   : > { %v1457_v36 = vpop.xlane.xlu0 %1456 }
 0xc13   : > { %v1481_v43 = vadd.f32 0.001, %v1477_v53  ;;  %v1478_v29 = vmul.f32 0.003921569, %v1474_v8  ;;  %v1475_v52 = vsub.f32 %v1457_v36, %v1471_v45 }
 0xc14   : > { %v1460_v31 = vpop.xlane.xlu1 %1459 }
 0xc15   : > { %1854 = vrsqrt.f32 %v1481_v43  ;;  %v1482_v46 = vadd.f32 0.001, %v1478_v29  ;;  %v1479_v19 = vmul.f32 0.003921569, %v1475_v52  ;;  %v1476_v62 = vsub.f32 %v1460_v31, %v1472_v55 }
 0xc17   : > { %1856 = vrsqrt.f32 %v1482_v46  ;;  %v1483_v2 = vadd.f32 0.001, %v1479_v19  ;;  %v1480_v56 = vmul.f32 0.003921569, %v1476_v62 }
 0xc18   : > { %v1542_v17 = vpop.permute.xlu1 %1541 }
 0xc19   : > { %1858 = vrsqrt.f32 %v1483_v2  ;;  %v1484_v39 = vadd.f32 0.001, %v1480_v56 }
 0xc1a   : > { %v1547_v16 = vpop.permute.xlu0 %1546 }
 0xc1b   : > { %1860 = vrsqrt.f32 %v1484_v39 }
 0xc1f   : > { %v1855_v3 = vpop.eup %1854 }
 0xc20   : > { %v1494_v57 = vmul.f32 %v1855_v3, %v1741_v0 }
 0xc21   : > { %v1857_v54 = vpop.eup %1856 }
 0xc22   : > { %1508 = vperm.xlu0 %1798, %v1494_v57   ;;  %v1495_v9 = vmul.f32 %v1857_v54, %v1742_v37 }
 0xc23   : > { %v1859_v60 = vpop.eup %1858 }
 0xc24   : > { %1513 = vperm.xlu1 %1799, %v1495_v9   ;;  %v1496_v6 = vmul.f32 %v1859_v60, %v1743_v44 }
 0xc25   : > { %v1861_v4 = vpop.eup %1860 }
 0xc26   : > { %v1497_v11 = vmul.f32 %v1861_v4, %v1744_v1 }
 0xc28   : > { %1518 = vperm.xlu1 %1799, %v1496_v6   ;;  %1523 = vperm.xlu0 %1798, %v1497_v11  }
 0xc2c   : > { %1551 = vperm.xlu1 %1799, %v1747_v12   ;;  %1556 = vperm.xlu0 %1798, %v1748_v15  }
 0xca1   : > { %v1509_v18 = vpop.permute.xlu0 %1508 }
 0xca2   : > { %v1526_v22 = vmul.f32 %v1509_v18, %v1498_v25  ;;  %v1527_v61 = vmul.f32 %v1509_v18, %v1499_v40 }
 0xca3   : > { %v1514_v48 = vpop.permute.xlu1 %1513 }
 0xca4   : > { %v1559_v51 = vadd.f32 %v1542_v17, %v1526_v22  ;;  %v1560_v49 = vadd.f32 %v1542_v17, %v1527_v61  ;;  %v1528_v7 = vmul.f32 %v1514_v48, %v1500_v38  ;;  %v1529_v20 = vmul.f32 %v1514_v48, %v1501_v41 }
 0xca6   : > { %v1567_v24 = vmax.f32 %v1559_v51, 0.0  ;;  %v1568_v35 = vmax.f32 %v1560_v49, 0.0  ;;  %v1561_v30 = vadd.f32 %v1547_v16, %v1528_v7  ;;  %v1562_v25 = vadd.f32 %v1547_v16, %v1529_v20 }
 0xca7   : > { %v1524_v14 = vpop.permute.xlu0 %1523  ;;  %v1519_v42 = vpop.permute.xlu1 %1518 }
 0xca8   : > { %1575 = vst [vmem:[%s217_s26] sm:$0xff] %v1567_v24  ;;  %1576 = vst [vmem:[%s217_s26 + $0x8] sm:$0xff] %v1568_v35  ;;  %v1569_v26 = vmax.f32 %v1561_v30, 0.0  ;;  %v1570_v21 = vmax.f32 %v1562_v25, 0.0  ;;  %v1532_v32 = vmul.f32 %v1524_v14, %v1504_v10  ;;  %v1533_v63 = vmul.f32 %v1524_v14, %v1505_v34 }
 0xca9   : > { %v1530_v23 = vmul.f32 %v1519_v42, %v1502_v59  ;;  %v1531_v40 = vmul.f32 %v1519_v42, %v1503_v28 }
 0xcaa   : > { %1577 = vst [vmem:[%s217_s26 + $0x10] sm:$0xff] %v1569_v26  ;;  %1578 = vst [vmem:[%s217_s26 + $0x18] sm:$0xff] %v1570_v21 }
 0xcab   : > { %v1557_v38 = vpop.permute.xlu0 %1556  ;;  %v1552_v41 = vpop.permute.xlu1 %1551 }
 0xcac   : > { %v1565_v27 = vadd.f32 %v1557_v38, %v1532_v32  ;;  %v1566_v13 = vadd.f32 %v1557_v38, %v1533_v63  ;;  %v1563_v10 = vadd.f32 %v1552_v41, %v1530_v23  ;;  %v1564_v53 = vadd.f32 %v1552_v41, %v1531_v40 }
 0xcae   : > { %v1573_v50 = vmax.f32 %v1565_v27, 0.0  ;;  %v1574_v58 = vmax.f32 %v1566_v13, 0.0  ;;  %v1571_v47 = vmax.f32 %v1563_v10, 0.0  ;;  %v1572_v5 = vmax.f32 %v1564_v53, 0.0 }
 0xcb0   : > { %1581 = vst [vmem:[%s217_s26 + $0x30] sm:$0xff] %v1573_v50  ;;  %1582 = vst [vmem:[%s217_s26 + $0x38] sm:$0xff] %v1574_v58 }
 0xcb1   : > { %1579 = vst [vmem:[%s217_s26 + $0x20] sm:$0xff] %v1571_v47  ;;  %1580 = vst [vmem:[%s217_s26 + $0x28] sm:$0xff] %v1572_v5 }
 0xcb2   : > { %1875 = shalt.err (!%p1872_p3)
}
 0xcb3   : > { %s1876_s14 = scalar_lea.hbm %s2764_s9, 1024  ;;  %s1880_s17 = scalar_lea.hbm %s2816_s5, 2048 }
 0xcb4   : > { %p1877_p4 = scmp.ne.s32.totalorder %s2764_s9, %s1876_s14  ;;  %p1881_p9 = scmp.lt.u32.totalorder %s2764_s9, %s2816_s5 }
 0xcb5   : > { %p1882_p10 = scmp.lt.u32.totalorder %s1880_s17, %s1876_s14  ;;  %p1884_p12 = scmp.lt.u32.totalorder %s1876_s14, %s2764_s9 }
 0xcb6   : > { %p1878_p7 = pnand %p1877_p4, %p1998_p5 }
 0xcb7   : > { %p1883_p11 = por %p1882_p10, %p1881_p9 }
 0xcb8   : > { %p1879_p8 = pneg %p1878_p7 }
 0xcb9   : > { %p1885_p13 = por %p1884_p12, %p1883_p11 }
 0xcbb   : > { %p1886_p0 = pnand %p1885_p13, %p1879_p8 }
 0xcbd   : > { %1889 = shalt.err (!%p1886_p0)
}
 0xcbe   : > { %s1928_s26 = smov 256   ;;  %s1929_s30 = smov 16  }
 0xcbf   : > { %1756 = dma.vmem_to_hbm [thread:$0]  (%p1998_p5), %s2766_s6, 1024, %s2764_s9, %s2770_s22, %s1928_s26, %s1928_s26, %s1929_s30  }
 0xcc0 PF: > { %p1762_p1 = scmp.ge.s32.totalorder %s1924_s21, 2  ;;  %s1612_s7 = sand.u32 1, %s1912_s18  }
 0xcc1   : > { %s1613_s8 = scalar_lea.sflag [#allocation3], %s1612_s7 }
 0xcc2   : > { %p1759_p2 = pnand %p1762_p1, %p2002_p6 }
 0xcc4   : > { %1907 = dma.done.wait (!%p1759_p2), %s1613_s8, 1024  }
 0xcc5   : > { %1909 = vsyncadd (!%p1759_p2), %s1613_s8, 4294966272  ;;  %p15_p3 = scmp.ge.s32.totalorder %s1985_s24, 4   ;;  %s2819_s18 = smov %s1916_s19 }
 0xcc6   : > { %s2820_s19 = smov %s1920_s20  ;;  %s2821_s20 = smov %s1996_s27 }
 0xcc7   : > { %s2822_s21 = smov %s1985_s24  ;;  %17 = sbr.rel (!%p15_p3) target bundleno = 3 (0x3), region = 89 }
 0xcce   :  { %1618 = vsyncpa [#allocation3], 1 }
 0xccf   :  { %1620 = vsyncpa [#allocation3 + $0x1], 1 }

</bundles_post_ra>
